<compile_context>
chip_gen: v6e
topology: v6e:2x2x1
jax: 0.10.0
libtpu: 0.0.40
codegen_flags: <defaults>
</compile_context>

<pallas_src>
import functools

import jax
import jax.numpy as jnp
from jax.experimental import pallas as pl
from jax.experimental.pallas import tpu as pltpu


# ------------------------- fused Net forward kernel --------------------------
def _net_kernel(x_ref, h0_ref, c0_ref, *rest, seq, batch, hidden, num_layers):
    # rest = [w_ih_t, w_hh_t, b] * num_layers, fc_w_t, fc_b, out_ref, seq_sc, xp_sc
    layer_refs = rest[:3 * num_layers]
    fc_w_ref = rest[3 * num_layers + 0]
    fc_b_ref = rest[3 * num_layers + 1]
    out_ref = rest[3 * num_layers + 2]
    seq_sc = rest[3 * num_layers + 3]   # (seq*batch, hidden)  inter-layer buffer
    xp_sc = rest[3 * num_layers + 4]    # (seq*batch, 4*hidden) projected inputs

    H = hidden
    B = batch

    h = None
    for layer in range(num_layers):
        wih_ref = layer_refs[3 * layer + 0]   # (in_feat, 4H)
        whh_ref = layer_refs[3 * layer + 1]   # (H, 4H)
        b_ref = layer_refs[3 * layer + 2]     # (1, 4H) = b_ih + b_hh

        # Layer input for all timesteps, already flattened to (seq*batch, feat).
        xin = x_ref[...] if layer == 0 else seq_sc[...]

        # Input projection + bias for ALL timesteps in one MXU call (hoisted out of
        # the recurrence; bias broadcast happens once per layer, not per step).
        xp_sc[...] = (jnp.dot(xin, wih_ref[...],
                              preferred_element_type=jnp.float32) + b_ref[...])

        whh = whh_ref[...]                    # loop-invariant, stays in vregs
        h = h0_ref[layer]                     # (B, H)
        c = c0_ref[layer]                     # (B, H)
        is_last = (layer == num_layers - 1)

        # Fully-unrolled serial recurrence over time (seq is small & static).
        for t in range(seq):
            gates = xp_sc[pl.ds(t * B, B), :] + jnp.dot(
                h, whh, preferred_element_type=jnp.float32)     # (B, 4H), order i,f,g,o
            sg = jax.nn.sigmoid(gates)        # one EUP pass over the whole vreg
            th = jnp.tanh(gates)              # one EUP pass over the whole vreg
            i = sg[:, 0 * H:1 * H]
            f = sg[:, 1 * H:2 * H]
            g = th[:, 2 * H:3 * H]
            o = sg[:, 3 * H:4 * H]
            c = f * c + i * g
            h = o * jnp.tanh(c)
            if not is_last:
                # Only intermediate layers need the full output sequence; keep it in VMEM.
                seq_sc[pl.ds(t * B, B), :] = h

    # fc epilogue on the last timestep of the last layer only (== pred[:, -1, :]).
    out_ref[...] = (jnp.dot(h, fc_w_ref[...],
                            preferred_element_type=jnp.float32) + fc_b_ref[...])


def _full_spec(arr):
    nd = arr.ndim
    return pl.BlockSpec(arr.shape, lambda i, _nd=nd: (0,) * _nd)


def net_forward(params, x, h0, c0):
    """x: (batch, seq, input_size); h0/c0: (num_layers, batch, hidden) -> (batch, output)."""
    batch, seq, in_feat = x.shape
    num_layers, _, hidden = h0.shape
    out_size = params["fc_w_t"].shape[1]

    # Time-major and flattened to (seq*batch, in_feat) so the kernel never reshapes.
    x2d = jnp.transpose(x, (1, 0, 2)).reshape(seq * batch, in_feat)

    in_arrays = [x2d, h0, c0]
    for layer in params["lstm"]:
        in_arrays += [layer["w_ih_t"], layer["w_hh_t"], layer["b"]]
    in_arrays += [params["fc_w_t"], params["fc_b"]]
    in_specs = [_full_spec(a) for a in in_arrays]

    kernel = functools.partial(_net_kernel, seq=seq, batch=batch,
                               hidden=hidden, num_layers=num_layers)

    return pl.pallas_call(
        kernel,
        out_shape=jax.ShapeDtypeStruct((batch, out_size), jnp.float32),
        grid_spec=pltpu.PrefetchScalarGridSpec(
            num_scalar_prefetch=0,
            grid=(1,),                        # single kernel invocation; whole problem in VMEM
            in_specs=in_specs,
            out_specs=pl.BlockSpec((batch, out_size), lambda i: (0, 0)),
            scratch_shapes=[
                pltpu.VMEM((seq * batch, hidden), jnp.float32),       # inter-layer sequence
                pltpu.VMEM((seq * batch, 4 * hidden), jnp.float32),   # projected inputs
            ],
        ),
        compiler_params=pltpu.CompilerParams(
            dimension_semantics=("arbitrary",)),
    )(*in_arrays)


# --------------------------------- params init --------------------------------
def init_net_params(key, input_size, hidden_size, num_layers, output_size):
    """Deterministic init mimicking PyTorch's uniform(-1/sqrt(H), 1/sqrt(H))."""
    params = {"lstm": []}
    bound = 1.0 / float(hidden_size) ** 0.5
    for layer in range(num_layers):
        in_feat = input_size if layer == 0 else hidden_size
        key, k1, k2, k3, k4 = jax.random.split(key, 5)
        w_ih = jax.random.uniform(k1, (4 * hidden_size, in_feat), jnp.float32, -bound, bound)
        w_hh = jax.random.uniform(k2, (4 * hidden_size, hidden_size), jnp.float32, -bound, bound)
        b_ih = jax.random.uniform(k3, (4 * hidden_size,), jnp.float32, -bound, bound)
        b_hh = jax.random.uniform(k4, (4 * hidden_size,), jnp.float32, -bound, bound)
        params["lstm"].append({
            "w_ih_t": w_ih.T,                                  # (in_feat, 4H)
            "w_hh_t": w_hh.T,                                  # (H, 4H)
            "b": (b_ih + b_hh).reshape(1, 4 * hidden_size),    # (1, 4H)
        })
    key, k5, k6 = jax.random.split(key, 3)
    fc_w = jax.random.uniform(k5, (output_size, hidden_size), jnp.float32, -bound, bound)
    fc_b = jax.random.uniform(k6, (output_size,), jnp.float32, -bound, bound)
    params["fc_w_t"] = fc_w.T                                  # (H, out)
    params["fc_b"] = fc_b.reshape(1, output_size)              # (1, out)
    return params


# ------------------------------ pure-JAX reference -----------------------------
def net_reference(params, x, h0, c0):
    x_tm = jnp.transpose(x, (1, 0, 2))
    H = h0.shape[-1]
    for layer_idx, layer in enumerate(params["lstm"]):
        h, c = h0[layer_idx], c0[layer_idx]
        outs = []
        for t in range(x_tm.shape[0]):
            gates = x_tm[t] @ layer["w_ih_t"] + h @ layer["w_hh_t"] + layer["b"]
            i = jax.nn.sigmoid(gates[:, 0 * H:1 * H])
            f = jax.nn.sigmoid(gates[:, 1 * H:2 * H])
            g = jnp.tanh(gates[:, 2 * H:3 * H])
            o = jax.nn.sigmoid(gates[:, 3 * H:4 * H])
            c = f * c + i * g
            h = o * jnp.tanh(c)
            outs.append(h)
        x_tm = jnp.stack(outs, axis=0)
    return x_tm[-1] @ params["fc_w_t"] + params["fc_b"]


if __name__ == "__main__":
    # Small shapes consistent with the module's forward.
    batch, seq_len = 2, 8
    input_size, hidden_size, num_layers, output_size = 16, 32, 2, 4

    key = jax.random.PRNGKey(0)
    key, kx, kh, kc, kp = jax.random.split(key, 5)

    x = jax.random.normal(kx, (batch, seq_len, input_size), jnp.float32)
    # Deterministic replacement for the torch.randn h_0 / c_0 drawn in forward().
    h0 = jax.random.normal(kh, (num_layers, batch, hidden_size), jnp.float32)
    c0 = jax.random.normal(kc, (num_layers, batch, hidden_size), jnp.float32)

    params = init_net_params(kp, input_size, hidden_size, num_layers, output_size)

    pred = net_forward(params, x, h0, c0)
    pred = jax.block_until_ready(pred)

    ref = net_reference(params, x, h0, c0)
    assert pred.shape == (batch, output_size)
    assert jnp.allclose(pred, ref, atol=1e-4, rtol=1e-4), "mismatch vs pure-JAX reference"

    print("KERNEL_OK")
</pallas_src>

<mosaic_0001>
module attributes {stable_mosaic.version = 11 : i64} {
  func.func @_net_kernel(%arg0: i32, %arg1: memref<16x16xf32, #tpu.memory_space<vmem>>, %arg2: memref<2x2x32xf32, #tpu.memory_space<vmem>>, %arg3: memref<2x2x32xf32, #tpu.memory_space<vmem>>, %arg4: memref<16x128xf32, #tpu.memory_space<vmem>>, %arg5: memref<32x128xf32, #tpu.memory_space<vmem>>, %arg6: memref<1x128xf32, #tpu.memory_space<vmem>>, %arg7: memref<32x128xf32, #tpu.memory_space<vmem>>, %arg8: memref<32x128xf32, #tpu.memory_space<vmem>>, %arg9: memref<1x128xf32, #tpu.memory_space<vmem>>, %arg10: memref<32x4xf32, #tpu.memory_space<vmem>>, %arg11: memref<1x4xf32, #tpu.memory_space<vmem>>, %arg12: memref<2x4xf32, #tpu.memory_space<vmem>>, %arg13: memref<16x32xf32, #tpu.memory_space<vmem>>, %arg14: memref<16x128xf32, #tpu.memory_space<vmem>>) attributes {dimension_semantics = [#tpu.dimension_semantics<arbitrary>], iteration_bounds = array<i64: 1>, scalar_prefetch = 0 : i64, scratch_operands = 2 : i64, tpu.core_type = #tpu.core_type<tc>, window_params = [{pipeline_mode = #tpu.pipeline_mode<synchronous>, transform_indices = @transform_0, window_bounds = array<i64: 16, 16>}, {pipeline_mode = #tpu.pipeline_mode<synchronous>, transform_indices = @transform_1, window_bounds = array<i64: 2, 2, 32>}, {pipeline_mode = #tpu.pipeline_mode<synchronous>, transform_indices = @transform_2, window_bounds = array<i64: 2, 2, 32>}, {pipeline_mode = #tpu.pipeline_mode<synchronous>, transform_indices = @transform_3, window_bounds = array<i64: 16, 128>}, {pipeline_mode = #tpu.pipeline_mode<synchronous>, transform_indices = @transform_4, window_bounds = array<i64: 32, 128>}, {pipeline_mode = #tpu.pipeline_mode<synchronous>, transform_indices = @transform_5, window_bounds = array<i64: 1, 128>}, {pipeline_mode = #tpu.pipeline_mode<synchronous>, transform_indices = @transform_6, window_bounds = array<i64: 32, 128>}, {pipeline_mode = #tpu.pipeline_mode<synchronous>, transform_indices = @transform_7, window_bounds = array<i64: 32, 128>}, {pipeline_mode = #tpu.pipeline_mode<synchronous>, transform_indices = @transform_8, window_bounds = array<i64: 1, 128>}, {pipeline_mode = #tpu.pipeline_mode<synchronous>, transform_indices = @transform_9, window_bounds = array<i64: 32, 4>}, {pipeline_mode = #tpu.pipeline_mode<synchronous>, transform_indices = @transform_10, window_bounds = array<i64: 1, 4>}, {pipeline_mode = #tpu.pipeline_mode<synchronous>, transform_indices = @transform_11, window_bounds = array<i64: 2, 4>}]} {
    %c0 = arith.constant 0 : index
    %c0_0 = arith.constant 0 : index
    %0 = vector.load %arg1[%c0, %c0_0] : memref<16x16xf32, #tpu.memory_space<vmem>>, vector<16x16xf32>
    %c0_1 = arith.constant 0 : index
    %c0_2 = arith.constant 0 : index
    %1 = vector.load %arg4[%c0_1, %c0_2] : memref<16x128xf32, #tpu.memory_space<vmem>>, vector<16x128xf32>
    %cst = arith.constant dense<0.000000e+00> : vector<16x128xf32>
    %2 = tpu.matmul %0, %1, %cst {dimension_numbers = #tpu.dot_dimension_numbers<[1], [0], [0], [1], [0, 0, 1, 1], [], []>} : vector<16x16xf32>, vector<16x128xf32>, vector<16x128xf32> -> vector<16x128xf32>
    %c0_3 = arith.constant 0 : index
    %c0_4 = arith.constant 0 : index
    %3 = vector.load %arg6[%c0_3, %c0_4] : memref<1x128xf32, #tpu.memory_space<vmem>>, vector<1x128xf32>
    %4 = vector.broadcast %3 : vector<1x128xf32> to vector<16x128xf32>
    %5 = arith.addf %2, %4 : vector<16x128xf32>
    %c0_5 = arith.constant 0 : index
    %c0_6 = arith.constant 0 : index
    %6 = vector.load %arg14[%c0_5, %c0_6] : memref<16x128xf32, #tpu.memory_space<vmem>>, vector<16x128xf32>
    tpu.vector_store %arg14[%c0_5, %c0_6], %5 {strides = array<i32>} : memref<16x128xf32, #tpu.memory_space<vmem>>, vector<16x128xf32>,
    %c0_7 = arith.constant 0 : index
    %c0_8 = arith.constant 0 : index
    %7 = vector.load %arg5[%c0_7, %c0_8] : memref<32x128xf32, #tpu.memory_space<vmem>>, vector<32x128xf32>
    %c0_9 = arith.constant 0 : index
    %c0_10 = arith.constant 0 : index
    %c0_11 = arith.constant 0 : index
    %8 = vector.load %arg2[%c0_9, %c0_10, %c0_11] : memref<2x2x32xf32, #tpu.memory_space<vmem>>, vector<1x2x32xf32>
    %9 = vector.shape_cast %8 : vector<1x2x32xf32> to vector<2x32xf32>
    %c0_12 = arith.constant 0 : index
    %c0_13 = arith.constant 0 : index
    %c0_14 = arith.constant 0 : index
    %10 = vector.load %arg3[%c0_12, %c0_13, %c0_14] : memref<2x2x32xf32, #tpu.memory_space<vmem>>, vector<1x2x32xf32>
    %11 = vector.shape_cast %10 : vector<1x2x32xf32> to vector<2x32xf32>
    %c0_15 = arith.constant 0 : index
    %c0_16 = arith.constant 0 : index
    %12 = vector.load %arg14[%c0_15, %c0_16] : memref<16x128xf32, #tpu.memory_space<vmem>>, vector<2x128xf32>
    %cst_17 = arith.constant dense<0.000000e+00> : vector<2x128xf32>
    %13 = tpu.matmul %9, %7, %cst_17 {dimension_numbers = #tpu.dot_dimension_numbers<[1], [0], [0], [1], [0, 0, 1, 1], [], []>} : vector<2x32xf32>, vector<32x128xf32>, vector<2x128xf32> -> vector<2x128xf32>
    %14 = arith.addf %12, %13 : vector<2x128xf32>
    %15 = arith.negf %14 : vector<2x128xf32>
    %16 = math.exp %15 : vector<2x128xf32>
    %cst_18 = arith.constant 1.000000e+00 : f32
    %17 = vector.broadcast %cst_18 : f32 to vector<2x128xf32>
    %18 = arith.addf %17, %16 : vector<2x128xf32>
    %19 = arith.divf %17, %18 : vector<2x128xf32>
    %20 = math.tanh %14 : vector<2x128xf32>
    %21 = vector.extract_strided_slice %19 {offsets = [0, 0], sizes = [2, 32], strides = [1, 1]} : vector<2x128xf32> to vector<2x32xf32>
    %22 = vector.extract_strided_slice %19 {offsets = [0, 32], sizes = [2, 32], strides = [1, 1]} : vector<2x128xf32> to vector<2x32xf32>
    %23 = vector.extract_strided_slice %20 {offsets = [0, 64], sizes = [2, 32], strides = [1, 1]} : vector<2x128xf32> to vector<2x32xf32>
    %24 = vector.extract_strided_slice %19 {offsets = [0, 96], sizes = [2, 32], strides = [1, 1]} : vector<2x128xf32> to vector<2x32xf32>
    %25 = arith.mulf %22, %11 : vector<2x32xf32>
    %26 = arith.mulf %21, %23 : vector<2x32xf32>
    %27 = arith.addf %25, %26 : vector<2x32xf32>
    %28 = math.tanh %27 : vector<2x32xf32>
    %29 = arith.mulf %24, %28 : vector<2x32xf32>
    %c0_19 = arith.constant 0 : index
    %c0_20 = arith.constant 0 : index
    %30 = vector.load %arg13[%c0_19, %c0_20] : memref<16x32xf32, #tpu.memory_space<vmem>>, vector<2x32xf32>
    tpu.vector_store %arg13[%c0_19, %c0_20], %29 {strides = array<i32>} : memref<16x32xf32, #tpu.memory_space<vmem>>, vector<2x32xf32>,
    %c2 = arith.constant 2 : index
    %c0_21 = arith.constant 0 : index
    %31 = vector.load %arg14[%c2, %c0_21] : memref<16x128xf32, #tpu.memory_space<vmem>>, vector<2x128xf32>
    %cst_22 = arith.constant dense<0.000000e+00> : vector<2x128xf32>
    %32 = tpu.matmul %29, %7, %cst_22 {dimension_numbers = #tpu.dot_dimension_numbers<[1], [0], [0], [1], [0, 0, 1, 1], [], []>} : vector<2x32xf32>, vector<32x128xf32>, vector<2x128xf32> -> vector<2x128xf32>
    %33 = arith.addf %31, %32 : vector<2x128xf32>
    %34 = arith.negf %33 : vector<2x128xf32>
    %35 = math.exp %34 : vector<2x128xf32>
    %cst_23 = arith.constant 1.000000e+00 : f32
    %36 = vector.broadcast %cst_23 : f32 to vector<2x128xf32>
    %37 = arith.addf %36, %35 : vector<2x128xf32>
    %38 = arith.divf %36, %37 : vector<2x128xf32>
    %39 = math.tanh %33 : vector<2x128xf32>
    %40 = vector.extract_strided_slice %38 {offsets = [0, 0], sizes = [2, 32], strides = [1, 1]} : vector<2x128xf32> to vector<2x32xf32>
    %41 = vector.extract_strided_slice %38 {offsets = [0, 32], sizes = [2, 32], strides = [1, 1]} : vector<2x128xf32> to vector<2x32xf32>
    %42 = vector.extract_strided_slice %39 {offsets = [0, 64], sizes = [2, 32], strides = [1, 1]} : vector<2x128xf32> to vector<2x32xf32>
    %43 = vector.extract_strided_slice %38 {offsets = [0, 96], sizes = [2, 32], strides = [1, 1]} : vector<2x128xf32> to vector<2x32xf32>
    %44 = arith.mulf %41, %27 : vector<2x32xf32>
    %45 = arith.mulf %40, %42 : vector<2x32xf32>
    %46 = arith.addf %44, %45 : vector<2x32xf32>
    %47 = math.tanh %46 : vector<2x32xf32>
    %48 = arith.mulf %43, %47 : vector<2x32xf32>
    %c2_24 = arith.constant 2 : index
    %c0_25 = arith.constant 0 : index
    %49 = vector.load %arg13[%c2_24, %c0_25] : memref<16x32xf32, #tpu.memory_space<vmem>>, vector<2x32xf32>
    tpu.vector_store %arg13[%c2_24, %c0_25], %48 {strides = array<i32>} : memref<16x32xf32, #tpu.memory_space<vmem>>, vector<2x32xf32>,
    %c4 = arith.constant 4 : index
    %c0_26 = arith.constant 0 : index
    %50 = vector.load %arg14[%c4, %c0_26] : memref<16x128xf32, #tpu.memory_space<vmem>>, vector<2x128xf32>
    %cst_27 = arith.constant dense<0.000000e+00> : vector<2x128xf32>
    %51 = tpu.matmul %48, %7, %cst_27 {dimension_numbers = #tpu.dot_dimension_numbers<[1], [0], [0], [1], [0, 0, 1, 1], [], []>} : vector<2x32xf32>, vector<32x128xf32>, vector<2x128xf32> -> vector<2x128xf32>
    %52 = arith.addf %50, %51 : vector<2x128xf32>
    %53 = arith.negf %52 : vector<2x128xf32>
    %54 = math.exp %53 : vector<2x128xf32>
    %cst_28 = arith.constant 1.000000e+00 : f32
    %55 = vector.broadcast %cst_28 : f32 to vector<2x128xf32>
    %56 = arith.addf %55, %54 : vector<2x128xf32>
    %57 = arith.divf %55, %56 : vector<2x128xf32>
    %58 = math.tanh %52 : vector<2x128xf32>
    %59 = vector.extract_strided_slice %57 {offsets = [0, 0], sizes = [2, 32], strides = [1, 1]} : vector<2x128xf32> to vector<2x32xf32>
    %60 = vector.extract_strided_slice %57 {offsets = [0, 32], sizes = [2, 32], strides = [1, 1]} : vector<2x128xf32> to vector<2x32xf32>
    %61 = vector.extract_strided_slice %58 {offsets = [0, 64], sizes = [2, 32], strides = [1, 1]} : vector<2x128xf32> to vector<2x32xf32>
    %62 = vector.extract_strided_slice %57 {offsets = [0, 96], sizes = [2, 32], strides = [1, 1]} : vector<2x128xf32> to vector<2x32xf32>
    %63 = arith.mulf %60, %46 : vector<2x32xf32>
    %64 = arith.mulf %59, %61 : vector<2x32xf32>
    %65 = arith.addf %63, %64 : vector<2x32xf32>
    %66 = math.tanh %65 : vector<2x32xf32>
    %67 = arith.mulf %62, %66 : vector<2x32xf32>
    %c4_29 = arith.constant 4 : index
    %c0_30 = arith.constant 0 : index
    %68 = vector.load %arg13[%c4_29, %c0_30] : memref<16x32xf32, #tpu.memory_space<vmem>>, vector<2x32xf32>
    tpu.vector_store %arg13[%c4_29, %c0_30], %67 {strides = array<i32>} : memref<16x32xf32, #tpu.memory_space<vmem>>, vector<2x32xf32>,
    %c6 = arith.constant 6 : index
    %c0_31 = arith.constant 0 : index
    %69 = vector.load %arg14[%c6, %c0_31] : memref<16x128xf32, #tpu.memory_space<vmem>>, vector<2x128xf32>
    %cst_32 = arith.constant dense<0.000000e+00> : vector<2x128xf32>
    %70 = tpu.matmul %67, %7, %cst_32 {dimension_numbers = #tpu.dot_dimension_numbers<[1], [0], [0], [1], [0, 0, 1, 1], [], []>} : vector<2x32xf32>, vector<32x128xf32>, vector<2x128xf32> -> vector<2x128xf32>
    %71 = arith.addf %69, %70 : vector<2x128xf32>
    %72 = arith.negf %71 : vector<2x128xf32>
    %73 = math.exp %72 : vector<2x128xf32>
    %cst_33 = arith.constant 1.000000e+00 : f32
    %74 = vector.broadcast %cst_33 : f32 to vector<2x128xf32>
    %75 = arith.addf %74, %73 : vector<2x128xf32>
    %76 = arith.divf %74, %75 : vector<2x128xf32>
    %77 = math.tanh %71 : vector<2x128xf32>
    %78 = vector.extract_strided_slice %76 {offsets = [0, 0], sizes = [2, 32], strides = [1, 1]} : vector<2x128xf32> to vector<2x32xf32>
    %79 = vector.extract_strided_slice %76 {offsets = [0, 32], sizes = [2, 32], strides = [1, 1]} : vector<2x128xf32> to vector<2x32xf32>
    %80 = vector.extract_strided_slice %77 {offsets = [0, 64], sizes = [2, 32], strides = [1, 1]} : vector<2x128xf32> to vector<2x32xf32>
    %81 = vector.extract_strided_slice %76 {offsets = [0, 96], sizes = [2, 32], strides = [1, 1]} : vector<2x128xf32> to vector<2x32xf32>
    %82 = arith.mulf %79, %65 : vector<2x32xf32>
    %83 = arith.mulf %78, %80 : vector<2x32xf32>
    %84 = arith.addf %82, %83 : vector<2x32xf32>
    %85 = math.tanh %84 : vector<2x32xf32>
    %86 = arith.mulf %81, %85 : vector<2x32xf32>
    %c6_34 = arith.constant 6 : index
    %c0_35 = arith.constant 0 : index
    %87 = vector.load %arg13[%c6_34, %c0_35] : memref<16x32xf32, #tpu.memory_space<vmem>>, vector<2x32xf32>
    tpu.vector_store %arg13[%c6_34, %c0_35], %86 {strides = array<i32>} : memref<16x32xf32, #tpu.memory_space<vmem>>, vector<2x32xf32>,
    %c8 = arith.constant 8 : index
    %c0_36 = arith.constant 0 : index
    %88 = vector.load %arg14[%c8, %c0_36] : memref<16x128xf32, #tpu.memory_space<vmem>>, vector<2x128xf32>
    %cst_37 = arith.constant dense<0.000000e+00> : vector<2x128xf32>
    %89 = tpu.matmul %86, %7, %cst_37 {dimension_numbers = #tpu.dot_dimension_numbers<[1], [0], [0], [1], [0, 0, 1, 1], [], []>} : vector<2x32xf32>, vector<32x128xf32>, vector<2x128xf32> -> vector<2x128xf32>
    %90 = arith.addf %88, %89 : vector<2x128xf32>
    %91 = arith.negf %90 : vector<2x128xf32>
    %92 = math.exp %91 : vector<2x128xf32>
    %cst_38 = arith.constant 1.000000e+00 : f32
    %93 = vector.broadcast %cst_38 : f32 to vector<2x128xf32>
    %94 = arith.addf %93, %92 : vector<2x128xf32>
    %95 = arith.divf %93, %94 : vector<2x128xf32>
    %96 = math.tanh %90 : vector<2x128xf32>
    %97 = vector.extract_strided_slice %95 {offsets = [0, 0], sizes = [2, 32], strides = [1, 1]} : vector<2x128xf32> to vector<2x32xf32>
    %98 = vector.extract_strided_slice %95 {offsets = [0, 32], sizes = [2, 32], strides = [1, 1]} : vector<2x128xf32> to vector<2x32xf32>
    %99 = vector.extract_strided_slice %96 {offsets = [0, 64], sizes = [2, 32], strides = [1, 1]} : vector<2x128xf32> to vector<2x32xf32>
    %100 = vector.extract_strided_slice %95 {offsets = [0, 96], sizes = [2, 32], strides = [1, 1]} : vector<2x128xf32> to vector<2x32xf32>
    %101 = arith.mulf %98, %84 : vector<2x32xf32>
    %102 = arith.mulf %97, %99 : vector<2x32xf32>
    %103 = arith.addf %101, %102 : vector<2x32xf32>
    %104 = math.tanh %103 : vector<2x32xf32>
    %105 = arith.mulf %100, %104 : vector<2x32xf32>
    %c8_39 = arith.constant 8 : index
    %c0_40 = arith.constant 0 : index
    %106 = vector.load %arg13[%c8_39, %c0_40] : memref<16x32xf32, #tpu.memory_space<vmem>>, vector<2x32xf32>
    tpu.vector_store %arg13[%c8_39, %c0_40], %105 {strides = array<i32>} : memref<16x32xf32, #tpu.memory_space<vmem>>, vector<2x32xf32>,
    %c10 = arith.constant 10 : index
    %c0_41 = arith.constant 0 : index
    %107 = vector.load %arg14[%c10, %c0_41] : memref<16x128xf32, #tpu.memory_space<vmem>>, vector<2x128xf32>
    %cst_42 = arith.constant dense<0.000000e+00> : vector<2x128xf32>
    %108 = tpu.matmul %105, %7, %cst_42 {dimension_numbers = #tpu.dot_dimension_numbers<[1], [0], [0], [1], [0, 0, 1, 1], [], []>} : vector<2x32xf32>, vector<32x128xf32>, vector<2x128xf32> -> vector<2x128xf32>
    %109 = arith.addf %107, %108 : vector<2x128xf32>
    %110 = arith.negf %109 : vector<2x128xf32>
    %111 = math.exp %110 : vector<2x128xf32>
    %cst_43 = arith.constant 1.000000e+00 : f32
    %112 = vector.broadcast %cst_43 : f32 to vector<2x128xf32>
    %113 = arith.addf %112, %111 : vector<2x128xf32>
    %114 = arith.divf %112, %113 : vector<2x128xf32>
    %115 = math.tanh %109 : vector<2x128xf32>
    %116 = vector.extract_strided_slice %114 {offsets = [0, 0], sizes = [2, 32], strides = [1, 1]} : vector<2x128xf32> to vector<2x32xf32>
    %117 = vector.extract_strided_slice %114 {offsets = [0, 32], sizes = [2, 32], strides = [1, 1]} : vector<2x128xf32> to vector<2x32xf32>
    %118 = vector.extract_strided_slice %115 {offsets = [0, 64], sizes = [2, 32], strides = [1, 1]} : vector<2x128xf32> to vector<2x32xf32>
    %119 = vector.extract_strided_slice %114 {offsets = [0, 96], sizes = [2, 32], strides = [1, 1]} : vector<2x128xf32> to vector<2x32xf32>
    %120 = arith.mulf %117, %103 : vector<2x32xf32>
    %121 = arith.mulf %116, %118 : vector<2x32xf32>
    %122 = arith.addf %120, %121 : vector<2x32xf32>
    %123 = math.tanh %122 : vector<2x32xf32>
    %124 = arith.mulf %119, %123 : vector<2x32xf32>
    %c10_44 = arith.constant 10 : index
    %c0_45 = arith.constant 0 : index
    %125 = vector.load %arg13[%c10_44, %c0_45] : memref<16x32xf32, #tpu.memory_space<vmem>>, vector<2x32xf32>
    tpu.vector_store %arg13[%c10_44, %c0_45], %124 {strides = array<i32>} : memref<16x32xf32, #tpu.memory_space<vmem>>, vector<2x32xf32>,
    %c12 = arith.constant 12 : index
    %c0_46 = arith.constant 0 : index
    %126 = vector.load %arg14[%c12, %c0_46] : memref<16x128xf32, #tpu.memory_space<vmem>>, vector<2x128xf32>
    %cst_47 = arith.constant dense<0.000000e+00> : vector<2x128xf32>
    %127 = tpu.matmul %124, %7, %cst_47 {dimension_numbers = #tpu.dot_dimension_numbers<[1], [0], [0], [1], [0, 0, 1, 1], [], []>} : vector<2x32xf32>, vector<32x128xf32>, vector<2x128xf32> -> vector<2x128xf32>
    %128 = arith.addf %126, %127 : vector<2x128xf32>
    %129 = arith.negf %128 : vector<2x128xf32>
    %130 = math.exp %129 : vector<2x128xf32>
    %cst_48 = arith.constant 1.000000e+00 : f32
    %131 = vector.broadcast %cst_48 : f32 to vector<2x128xf32>
    %132 = arith.addf %131, %130 : vector<2x128xf32>
    %133 = arith.divf %131, %132 : vector<2x128xf32>
    %134 = math.tanh %128 : vector<2x128xf32>
    %135 = vector.extract_strided_slice %133 {offsets = [0, 0], sizes = [2, 32], strides = [1, 1]} : vector<2x128xf32> to vector<2x32xf32>
    %136 = vector.extract_strided_slice %133 {offsets = [0, 32], sizes = [2, 32], strides = [1, 1]} : vector<2x128xf32> to vector<2x32xf32>
    %137 = vector.extract_strided_slice %134 {offsets = [0, 64], sizes = [2, 32], strides = [1, 1]} : vector<2x128xf32> to vector<2x32xf32>
    %138 = vector.extract_strided_slice %133 {offsets = [0, 96], sizes = [2, 32], strides = [1, 1]} : vector<2x128xf32> to vector<2x32xf32>
    %139 = arith.mulf %136, %122 : vector<2x32xf32>
    %140 = arith.mulf %135, %137 : vector<2x32xf32>
    %141 = arith.addf %139, %140 : vector<2x32xf32>
    %142 = math.tanh %141 : vector<2x32xf32>
    %143 = arith.mulf %138, %142 : vector<2x32xf32>
    %c12_49 = arith.constant 12 : index
    %c0_50 = arith.constant 0 : index
    %144 = vector.load %arg13[%c12_49, %c0_50] : memref<16x32xf32, #tpu.memory_space<vmem>>, vector<2x32xf32>
    tpu.vector_store %arg13[%c12_49, %c0_50], %143 {strides = array<i32>} : memref<16x32xf32, #tpu.memory_space<vmem>>, vector<2x32xf32>,
    %c14 = arith.constant 14 : index
    %c0_51 = arith.constant 0 : index
    %145 = vector.load %arg14[%c14, %c0_51] : memref<16x128xf32, #tpu.memory_space<vmem>>, vector<2x128xf32>
    %cst_52 = arith.constant dense<0.000000e+00> : vector<2x128xf32>
    %146 = tpu.matmul %143, %7, %cst_52 {dimension_numbers = #tpu.dot_dimension_numbers<[1], [0], [0], [1], [0, 0, 1, 1], [], []>} : vector<2x32xf32>, vector<32x128xf32>, vector<2x128xf32> -> vector<2x128xf32>
    %147 = arith.addf %145, %146 : vector<2x128xf32>
    %148 = arith.negf %147 : vector<2x128xf32>
    %149 = math.exp %148 : vector<2x128xf32>
    %cst_53 = arith.constant 1.000000e+00 : f32
    %150 = vector.broadcast %cst_53 : f32 to vector<2x128xf32>
    %151 = arith.addf %150, %149 : vector<2x128xf32>
    %152 = arith.divf %150, %151 : vector<2x128xf32>
    %153 = math.tanh %147 : vector<2x128xf32>
    %154 = vector.extract_strided_slice %152 {offsets = [0, 0], sizes = [2, 32], strides = [1, 1]} : vector<2x128xf32> to vector<2x32xf32>
    %155 = vector.extract_strided_slice %152 {offsets = [0, 32], sizes = [2, 32], strides = [1, 1]} : vector<2x128xf32> to vector<2x32xf32>
    %156 = vector.extract_strided_slice %153 {offsets = [0, 64], sizes = [2, 32], strides = [1, 1]} : vector<2x128xf32> to vector<2x32xf32>
    %157 = vector.extract_strided_slice %152 {offsets = [0, 96], sizes = [2, 32], strides = [1, 1]} : vector<2x128xf32> to vector<2x32xf32>
    %158 = arith.mulf %155, %141 : vector<2x32xf32>
    %159 = arith.mulf %154, %156 : vector<2x32xf32>
    %160 = arith.addf %158, %159 : vector<2x32xf32>
    %161 = math.tanh %160 : vector<2x32xf32>
    %162 = arith.mulf %157, %161 : vector<2x32xf32>
    %c14_54 = arith.constant 14 : index
    %c0_55 = arith.constant 0 : index
    %163 = vector.load %arg13[%c14_54, %c0_55] : memref<16x32xf32, #tpu.memory_space<vmem>>, vector<2x32xf32>
    tpu.vector_store %arg13[%c14_54, %c0_55], %162 {strides = array<i32>} : memref<16x32xf32, #tpu.memory_space<vmem>>, vector<2x32xf32>,
    %c0_56 = arith.constant 0 : index
    %c0_57 = arith.constant 0 : index
    %164 = vector.load %arg13[%c0_56, %c0_57] : memref<16x32xf32, #tpu.memory_space<vmem>>, vector<16x32xf32>
    %c0_58 = arith.constant 0 : index
    %c0_59 = arith.constant 0 : index
    %165 = vector.load %arg7[%c0_58, %c0_59] : memref<32x128xf32, #tpu.memory_space<vmem>>, vector<32x128xf32>
    %cst_60 = arith.constant dense<0.000000e+00> : vector<16x128xf32>
    %166 = tpu.matmul %164, %165, %cst_60 {dimension_numbers = #tpu.dot_dimension_numbers<[1], [0], [0], [1], [0, 0, 1, 1], [], []>} : vector<16x32xf32>, vector<32x128xf32>, vector<16x128xf32> -> vector<16x128xf32>
    %c0_61 = arith.constant 0 : index
    %c0_62 = arith.constant 0 : index
    %167 = vector.load %arg9[%c0_61, %c0_62] : memref<1x128xf32, #tpu.memory_space<vmem>>, vector<1x128xf32>
    %168 = vector.broadcast %167 : vector<1x128xf32> to vector<16x128xf32>
    %169 = arith.addf %166, %168 : vector<16x128xf32>
    %c0_63 = arith.constant 0 : index
    %c0_64 = arith.constant 0 : index
    %170 = vector.load %arg14[%c0_63, %c0_64] : memref<16x128xf32, #tpu.memory_space<vmem>>, vector<16x128xf32>
    tpu.vector_store %arg14[%c0_63, %c0_64], %169 {strides = array<i32>} : memref<16x128xf32, #tpu.memory_space<vmem>>, vector<16x128xf32>,
    %c0_65 = arith.constant 0 : index
    %c0_66 = arith.constant 0 : index
    %171 = vector.load %arg8[%c0_65, %c0_66] : memref<32x128xf32, #tpu.memory_space<vmem>>, vector<32x128xf32>
    %c1 = arith.constant 1 : index
    %c0_67 = arith.constant 0 : index
    %c0_68 = arith.constant 0 : index
    %172 = vector.load %arg2[%c1, %c0_67, %c0_68] : memref<2x2x32xf32, #tpu.memory_space<vmem>>, vector<1x2x32xf32>
    %173 = vector.shape_cast %172 : vector<1x2x32xf32> to vector<2x32xf32>
    %c1_69 = arith.constant 1 : index
    %c0_70 = arith.constant 0 : index
    %c0_71 = arith.constant 0 : index
    %174 = vector.load %arg3[%c1_69, %c0_70, %c0_71] : memref<2x2x32xf32, #tpu.memory_space<vmem>>, vector<1x2x32xf32>
    %175 = vector.shape_cast %174 : vector<1x2x32xf32> to vector<2x32xf32>
    %c0_72 = arith.constant 0 : index
    %c0_73 = arith.constant 0 : index
    %176 = vector.load %arg14[%c0_72, %c0_73] : memref<16x128xf32, #tpu.memory_space<vmem>>, vector<2x128xf32>
    %cst_74 = arith.constant dense<0.000000e+00> : vector<2x128xf32>
    %177 = tpu.matmul %173, %171, %cst_74 {dimension_numbers = #tpu.dot_dimension_numbers<[1], [0], [0], [1], [0, 0, 1, 1], [], []>} : vector<2x32xf32>, vector<32x128xf32>, vector<2x128xf32> -> vector<2x128xf32>
    %178 = arith.addf %176, %177 : vector<2x128xf32>
    %179 = arith.negf %178 : vector<2x128xf32>
    %180 = math.exp %179 : vector<2x128xf32>
    %cst_75 = arith.constant 1.000000e+00 : f32
    %181 = vector.broadcast %cst_75 : f32 to vector<2x128xf32>
    %182 = arith.addf %181, %180 : vector<2x128xf32>
    %183 = arith.divf %181, %182 : vector<2x128xf32>
    %184 = math.tanh %178 : vector<2x128xf32>
    %185 = vector.extract_strided_slice %183 {offsets = [0, 0], sizes = [2, 32], strides = [1, 1]} : vector<2x128xf32> to vector<2x32xf32>
    %186 = vector.extract_strided_slice %183 {offsets = [0, 32], sizes = [2, 32], strides = [1, 1]} : vector<2x128xf32> to vector<2x32xf32>
    %187 = vector.extract_strided_slice %184 {offsets = [0, 64], sizes = [2, 32], strides = [1, 1]} : vector<2x128xf32> to vector<2x32xf32>
    %188 = vector.extract_strided_slice %183 {offsets = [0, 96], sizes = [2, 32], strides = [1, 1]} : vector<2x128xf32> to vector<2x32xf32>
    %189 = arith.mulf %186, %175 : vector<2x32xf32>
    %190 = arith.mulf %185, %187 : vector<2x32xf32>
    %191 = arith.addf %189, %190 : vector<2x32xf32>
    %192 = math.tanh %191 : vector<2x32xf32>
    %193 = arith.mulf %188, %192 : vector<2x32xf32>
    %c2_76 = arith.constant 2 : index
    %c0_77 = arith.constant 0 : index
    %194 = vector.load %arg14[%c2_76, %c0_77] : memref<16x128xf32, #tpu.memory_space<vmem>>, vector<2x128xf32>
    %cst_78 = arith.constant dense<0.000000e+00> : vector<2x128xf32>
    %195 = tpu.matmul %193, %171, %cst_78 {dimension_numbers = #tpu.dot_dimension_numbers<[1], [0], [0], [1], [0, 0, 1, 1], [], []>} : vector<2x32xf32>, vector<32x128xf32>, vector<2x128xf32> -> vector<2x128xf32>
    %196 = arith.addf %194, %195 : vector<2x128xf32>
    %197 = arith.negf %196 : vector<2x128xf32>
    %198 = math.exp %197 : vector<2x128xf32>
    %cst_79 = arith.constant 1.000000e+00 : f32
    %199 = vector.broadcast %cst_79 : f32 to vector<2x128xf32>
    %200 = arith.addf %199, %198 : vector<2x128xf32>
    %201 = arith.divf %199, %200 : vector<2x128xf32>
    %202 = math.tanh %196 : vector<2x128xf32>
    %203 = vector.extract_strided_slice %201 {offsets = [0, 0], sizes = [2, 32], strides = [1, 1]} : vector<2x128xf32> to vector<2x32xf32>
    %204 = vector.extract_strided_slice %201 {offsets = [0, 32], sizes = [2, 32], strides = [1, 1]} : vector<2x128xf32> to vector<2x32xf32>
    %205 = vector.extract_strided_slice %202 {offsets = [0, 64], sizes = [2, 32], strides = [1, 1]} : vector<2x128xf32> to vector<2x32xf32>
    %206 = vector.extract_strided_slice %201 {offsets = [0, 96], sizes = [2, 32], strides = [1, 1]} : vector<2x128xf32> to vector<2x32xf32>
    %207 = arith.mulf %204, %191 : vector<2x32xf32>
    %208 = arith.mulf %203, %205 : vector<2x32xf32>
    %209 = arith.addf %207, %208 : vector<2x32xf32>
    %210 = math.tanh %209 : vector<2x32xf32>
    %211 = arith.mulf %206, %210 : vector<2x32xf32>
    %c4_80 = arith.constant 4 : index
    %c0_81 = arith.constant 0 : index
    %212 = vector.load %arg14[%c4_80, %c0_81] : memref<16x128xf32, #tpu.memory_space<vmem>>, vector<2x128xf32>
    %cst_82 = arith.constant dense<0.000000e+00> : vector<2x128xf32>
    %213 = tpu.matmul %211, %171, %cst_82 {dimension_numbers = #tpu.dot_dimension_numbers<[1], [0], [0], [1], [0, 0, 1, 1], [], []>} : vector<2x32xf32>, vector<32x128xf32>, vector<2x128xf32> -> vector<2x128xf32>
    %214 = arith.addf %212, %213 : vector<2x128xf32>
    %215 = arith.negf %214 : vector<2x128xf32>
    %216 = math.exp %215 : vector<2x128xf32>
    %cst_83 = arith.constant 1.000000e+00 : f32
    %217 = vector.broadcast %cst_83 : f32 to vector<2x128xf32>
    %218 = arith.addf %217, %216 : vector<2x128xf32>
    %219 = arith.divf %217, %218 : vector<2x128xf32>
    %220 = math.tanh %214 : vector<2x128xf32>
    %221 = vector.extract_strided_slice %219 {offsets = [0, 0], sizes = [2, 32], strides = [1, 1]} : vector<2x128xf32> to vector<2x32xf32>
    %222 = vector.extract_strided_slice %219 {offsets = [0, 32], sizes = [2, 32], strides = [1, 1]} : vector<2x128xf32> to vector<2x32xf32>
    %223 = vector.extract_strided_slice %220 {offsets = [0, 64], sizes = [2, 32], strides = [1, 1]} : vector<2x128xf32> to vector<2x32xf32>
    %224 = vector.extract_strided_slice %219 {offsets = [0, 96], sizes = [2, 32], strides = [1, 1]} : vector<2x128xf32> to vector<2x32xf32>
    %225 = arith.mulf %222, %209 : vector<2x32xf32>
    %226 = arith.mulf %221, %223 : vector<2x32xf32>
    %227 = arith.addf %225, %226 : vector<2x32xf32>
    %228 = math.tanh %227 : vector<2x32xf32>
    %229 = arith.mulf %224, %228 : vector<2x32xf32>
    %c6_84 = arith.constant 6 : index
    %c0_85 = arith.constant 0 : index
    %230 = vector.load %arg14[%c6_84, %c0_85] : memref<16x128xf32, #tpu.memory_space<vmem>>, vector<2x128xf32>
    %cst_86 = arith.constant dense<0.000000e+00> : vector<2x128xf32>
    %231 = tpu.matmul %229, %171, %cst_86 {dimension_numbers = #tpu.dot_dimension_numbers<[1], [0], [0], [1], [0, 0, 1, 1], [], []>} : vector<2x32xf32>, vector<32x128xf32>, vector<2x128xf32> -> vector<2x128xf32>
    %232 = arith.addf %230, %231 : vector<2x128xf32>
    %233 = arith.negf %232 : vector<2x128xf32>
    %234 = math.exp %233 : vector<2x128xf32>
    %cst_87 = arith.constant 1.000000e+00 : f32
    %235 = vector.broadcast %cst_87 : f32 to vector<2x128xf32>
    %236 = arith.addf %235, %234 : vector<2x128xf32>
    %237 = arith.divf %235, %236 : vector<2x128xf32>
    %238 = math.tanh %232 : vector<2x128xf32>
    %239 = vector.extract_strided_slice %237 {offsets = [0, 0], sizes = [2, 32], strides = [1, 1]} : vector<2x128xf32> to vector<2x32xf32>
    %240 = vector.extract_strided_slice %237 {offsets = [0, 32], sizes = [2, 32], strides = [1, 1]} : vector<2x128xf32> to vector<2x32xf32>
    %241 = vector.extract_strided_slice %238 {offsets = [0, 64], sizes = [2, 32], strides = [1, 1]} : vector<2x128xf32> to vector<2x32xf32>
    %242 = vector.extract_strided_slice %237 {offsets = [0, 96], sizes = [2, 32], strides = [1, 1]} : vector<2x128xf32> to vector<2x32xf32>
    %243 = arith.mulf %240, %227 : vector<2x32xf32>
    %244 = arith.mulf %239, %241 : vector<2x32xf32>
    %245 = arith.addf %243, %244 : vector<2x32xf32>
    %246 = math.tanh %245 : vector<2x32xf32>
    %247 = arith.mulf %242, %246 : vector<2x32xf32>
    %c8_88 = arith.constant 8 : index
    %c0_89 = arith.constant 0 : index
    %248 = vector.load %arg14[%c8_88, %c0_89] : memref<16x128xf32, #tpu.memory_space<vmem>>, vector<2x128xf32>
    %cst_90 = arith.constant dense<0.000000e+00> : vector<2x128xf32>
    %249 = tpu.matmul %247, %171, %cst_90 {dimension_numbers = #tpu.dot_dimension_numbers<[1], [0], [0], [1], [0, 0, 1, 1], [], []>} : vector<2x32xf32>, vector<32x128xf32>, vector<2x128xf32> -> vector<2x128xf32>
    %250 = arith.addf %248, %249 : vector<2x128xf32>
    %251 = arith.negf %250 : vector<2x128xf32>
    %252 = math.exp %251 : vector<2x128xf32>
    %cst_91 = arith.constant 1.000000e+00 : f32
    %253 = vector.broadcast %cst_91 : f32 to vector<2x128xf32>
    %254 = arith.addf %253, %252 : vector<2x128xf32>
    %255 = arith.divf %253, %254 : vector<2x128xf32>
    %256 = math.tanh %250 : vector<2x128xf32>
    %257 = vector.extract_strided_slice %255 {offsets = [0, 0], sizes = [2, 32], strides = [1, 1]} : vector<2x128xf32> to vector<2x32xf32>
    %258 = vector.extract_strided_slice %255 {offsets = [0, 32], sizes = [2, 32], strides = [1, 1]} : vector<2x128xf32> to vector<2x32xf32>
    %259 = vector.extract_strided_slice %256 {offsets = [0, 64], sizes = [2, 32], strides = [1, 1]} : vector<2x128xf32> to vector<2x32xf32>
    %260 = vector.extract_strided_slice %255 {offsets = [0, 96], sizes = [2, 32], strides = [1, 1]} : vector<2x128xf32> to vector<2x32xf32>
    %261 = arith.mulf %258, %245 : vector<2x32xf32>
    %262 = arith.mulf %257, %259 : vector<2x32xf32>
    %263 = arith.addf %261, %262 : vector<2x32xf32>
    %264 = math.tanh %263 : vector<2x32xf32>
    %265 = arith.mulf %260, %264 : vector<2x32xf32>
    %c10_92 = arith.constant 10 : index
    %c0_93 = arith.constant 0 : index
    %266 = vector.load %arg14[%c10_92, %c0_93] : memref<16x128xf32, #tpu.memory_space<vmem>>, vector<2x128xf32>
    %cst_94 = arith.constant dense<0.000000e+00> : vector<2x128xf32>
    %267 = tpu.matmul %265, %171, %cst_94 {dimension_numbers = #tpu.dot_dimension_numbers<[1], [0], [0], [1], [0, 0, 1, 1], [], []>} : vector<2x32xf32>, vector<32x128xf32>, vector<2x128xf32> -> vector<2x128xf32>
    %268 = arith.addf %266, %267 : vector<2x128xf32>
    %269 = arith.negf %268 : vector<2x128xf32>
    %270 = math.exp %269 : vector<2x128xf32>
    %cst_95 = arith.constant 1.000000e+00 : f32
    %271 = vector.broadcast %cst_95 : f32 to vector<2x128xf32>
    %272 = arith.addf %271, %270 : vector<2x128xf32>
    %273 = arith.divf %271, %272 : vector<2x128xf32>
    %274 = math.tanh %268 : vector<2x128xf32>
    %275 = vector.extract_strided_slice %273 {offsets = [0, 0], sizes = [2, 32], strides = [1, 1]} : vector<2x128xf32> to vector<2x32xf32>
    %276 = vector.extract_strided_slice %273 {offsets = [0, 32], sizes = [2, 32], strides = [1, 1]} : vector<2x128xf32> to vector<2x32xf32>
    %277 = vector.extract_strided_slice %274 {offsets = [0, 64], sizes = [2, 32], strides = [1, 1]} : vector<2x128xf32> to vector<2x32xf32>
    %278 = vector.extract_strided_slice %273 {offsets = [0, 96], sizes = [2, 32], strides = [1, 1]} : vector<2x128xf32> to vector<2x32xf32>
    %279 = arith.mulf %276, %263 : vector<2x32xf32>
    %280 = arith.mulf %275, %277 : vector<2x32xf32>
    %281 = arith.addf %279, %280 : vector<2x32xf32>
    %282 = math.tanh %281 : vector<2x32xf32>
    %283 = arith.mulf %278, %282 : vector<2x32xf32>
    %c12_96 = arith.constant 12 : index
    %c0_97 = arith.constant 0 : index
    %284 = vector.load %arg14[%c12_96, %c0_97] : memref<16x128xf32, #tpu.memory_space<vmem>>, vector<2x128xf32>
    %cst_98 = arith.constant dense<0.000000e+00> : vector<2x128xf32>
    %285 = tpu.matmul %283, %171, %cst_98 {dimension_numbers = #tpu.dot_dimension_numbers<[1], [0], [0], [1], [0, 0, 1, 1], [], []>} : vector<2x32xf32>, vector<32x128xf32>, vector<2x128xf32> -> vector<2x128xf32>
    %286 = arith.addf %284, %285 : vector<2x128xf32>
    %287 = arith.negf %286 : vector<2x128xf32>
    %288 = math.exp %287 : vector<2x128xf32>
    %cst_99 = arith.constant 1.000000e+00 : f32
    %289 = vector.broadcast %cst_99 : f32 to vector<2x128xf32>
    %290 = arith.addf %289, %288 : vector<2x128xf32>
    %291 = arith.divf %289, %290 : vector<2x128xf32>
    %292 = math.tanh %286 : vector<2x128xf32>
    %293 = vector.extract_strided_slice %291 {offsets = [0, 0], sizes = [2, 32], strides = [1, 1]} : vector<2x128xf32> to vector<2x32xf32>
    %294 = vector.extract_strided_slice %291 {offsets = [0, 32], sizes = [2, 32], strides = [1, 1]} : vector<2x128xf32> to vector<2x32xf32>
    %295 = vector.extract_strided_slice %292 {offsets = [0, 64], sizes = [2, 32], strides = [1, 1]} : vector<2x128xf32> to vector<2x32xf32>
    %296 = vector.extract_strided_slice %291 {offsets = [0, 96], sizes = [2, 32], strides = [1, 1]} : vector<2x128xf32> to vector<2x32xf32>
    %297 = arith.mulf %294, %281 : vector<2x32xf32>
    %298 = arith.mulf %293, %295 : vector<2x32xf32>
    %299 = arith.addf %297, %298 : vector<2x32xf32>
    %300 = math.tanh %299 : vector<2x32xf32>
    %301 = arith.mulf %296, %300 : vector<2x32xf32>
    %c14_100 = arith.constant 14 : index
    %c0_101 = arith.constant 0 : index
    %302 = vector.load %arg14[%c14_100, %c0_101] : memref<16x128xf32, #tpu.memory_space<vmem>>, vector<2x128xf32>
    %cst_102 = arith.constant dense<0.000000e+00> : vector<2x128xf32>
    %303 = tpu.matmul %301, %171, %cst_102 {dimension_numbers = #tpu.dot_dimension_numbers<[1], [0], [0], [1], [0, 0, 1, 1], [], []>} : vector<2x32xf32>, vector<32x128xf32>, vector<2x128xf32> -> vector<2x128xf32>
    %304 = arith.addf %302, %303 : vector<2x128xf32>
    %305 = arith.negf %304 : vector<2x128xf32>
    %306 = math.exp %305 : vector<2x128xf32>
    %cst_103 = arith.constant 1.000000e+00 : f32
    %307 = vector.broadcast %cst_103 : f32 to vector<2x128xf32>
    %308 = arith.addf %307, %306 : vector<2x128xf32>
    %309 = arith.divf %307, %308 : vector<2x128xf32>
    %310 = math.tanh %304 : vector<2x128xf32>
    %311 = vector.extract_strided_slice %309 {offsets = [0, 0], sizes = [2, 32], strides = [1, 1]} : vector<2x128xf32> to vector<2x32xf32>
    %312 = vector.extract_strided_slice %309 {offsets = [0, 32], sizes = [2, 32], strides = [1, 1]} : vector<2x128xf32> to vector<2x32xf32>
    %313 = vector.extract_strided_slice %310 {offsets = [0, 64], sizes = [2, 32], strides = [1, 1]} : vector<2x128xf32> to vector<2x32xf32>
    %314 = vector.extract_strided_slice %309 {offsets = [0, 96], sizes = [2, 32], strides = [1, 1]} : vector<2x128xf32> to vector<2x32xf32>
    %315 = arith.mulf %312, %299 : vector<2x32xf32>
    %316 = arith.mulf %311, %313 : vector<2x32xf32>
    %317 = arith.addf %315, %316 : vector<2x32xf32>
    %318 = math.tanh %317 : vector<2x32xf32>
    %319 = arith.mulf %314, %318 : vector<2x32xf32>
    %c0_104 = arith.constant 0 : index
    %c0_105 = arith.constant 0 : index
    %320 = vector.load %arg10[%c0_104, %c0_105] : memref<32x4xf32, #tpu.memory_space<vmem>>, vector<32x4xf32>
    %cst_106 = arith.constant dense<0.000000e+00> : vector<2x4xf32>
    %321 = tpu.matmul %319, %320, %cst_106 {dimension_numbers = #tpu.dot_dimension_numbers<[1], [0], [0], [1], [0, 0, 1, 1], [], []>} : vector<2x32xf32>, vector<32x4xf32>, vector<2x4xf32> -> vector<2x4xf32>
    %c0_107 = arith.constant 0 : index
    %c0_108 = arith.constant 0 : index
    %322 = vector.load %arg11[%c0_107, %c0_108] : memref<1x4xf32, #tpu.memory_space<vmem>>, vector<1x4xf32>
    %323 = vector.broadcast %322 : vector<1x4xf32> to vector<2x4xf32>
    %324 = arith.addf %321, %323 : vector<2x4xf32>
    %c0_109 = arith.constant 0 : index
    %c0_110 = arith.constant 0 : index
    %325 = vector.load %arg12[%c0_109, %c0_110] : memref<2x4xf32, #tpu.memory_space<vmem>>, vector<2x4xf32>
    tpu.vector_store %arg12[%c0_109, %c0_110], %324 {strides = array<i32>} : memref<2x4xf32, #tpu.memory_space<vmem>>, vector<2x4xf32>,
    return
  }
  func.func @transform_0(%arg0: i32) -> (i32, i32) {
    %c0_i32 = arith.constant 0 : i32
    %c0_i32_0 = arith.constant 0 : i32
    %c0_i32_1 = arith.constant 0 : i32
    return %c0_i32, %c0_i32_0 : i32, i32
  }
  func.func @transform_1(%arg0: i32) -> (i32, i32, i32) {
    %c0_i32 = arith.constant 0 : i32
    %c0_i32_0 = arith.constant 0 : i32
    %c0_i32_1 = arith.constant 0 : i32
    %c0_i32_2 = arith.constant 0 : i32
    return %c0_i32, %c0_i32_0, %c0_i32_1 : i32, i32, i32
  }
  func.func @transform_2(%arg0: i32) -> (i32, i32, i32) {
    %c0_i32 = arith.constant 0 : i32
    %c0_i32_0 = arith.constant 0 : i32
    %c0_i32_1 = arith.constant 0 : i32
    %c0_i32_2 = arith.constant 0 : i32
    return %c0_i32, %c0_i32_0, %c0_i32_1 : i32, i32, i32
  }
  func.func @transform_3(%arg0: i32) -> (i32, i32) {
    %c0_i32 = arith.constant 0 : i32
    %c0_i32_0 = arith.constant 0 : i32
    %c0_i32_1 = arith.constant 0 : i32
    return %c0_i32, %c0_i32_0 : i32, i32
  }
  func.func @transform_4(%arg0: i32) -> (i32, i32) {
    %c0_i32 = arith.constant 0 : i32
    %c0_i32_0 = arith.constant 0 : i32
    %c0_i32_1 = arith.constant 0 : i32
    return %c0_i32, %c0_i32_0 : i32, i32
  }
  func.func @transform_5(%arg0: i32) -> (i32, i32) {
    %c0_i32 = arith.constant 0 : i32
    %c0_i32_0 = arith.constant 0 : i32
    %c0_i32_1 = arith.constant 0 : i32
    return %c0_i32, %c0_i32_0 : i32, i32
  }
  func.func @transform_6(%arg0: i32) -> (i32, i32) {
    %c0_i32 = arith.constant 0 : i32
    %c0_i32_0 = arith.constant 0 : i32
    %c0_i32_1 = arith.constant 0 : i32
    return %c0_i32, %c0_i32_0 : i32, i32
  }
  func.func @transform_7(%arg0: i32) -> (i32, i32) {
    %c0_i32 = arith.constant 0 : i32
    %c0_i32_0 = arith.constant 0 : i32
    %c0_i32_1 = arith.constant 0 : i32
    return %c0_i32, %c0_i32_0 : i32, i32
  }
  func.func @transform_8(%arg0: i32) -> (i32, i32) {
    %c0_i32 = arith.constant 0 : i32
    %c0_i32_0 = arith.constant 0 : i32
    %c0_i32_1 = arith.constant 0 : i32
    return %c0_i32, %c0_i32_0 : i32, i32
  }
  func.func @transform_9(%arg0: i32) -> (i32, i32) {
    %c0_i32 = arith.constant 0 : i32
    %c0_i32_0 = arith.constant 0 : i32
    %c0_i32_1 = arith.constant 0 : i32
    return %c0_i32, %c0_i32_0 : i32, i32
  }
  func.func @transform_10(%arg0: i32) -> (i32, i32) {
    %c0_i32 = arith.constant 0 : i32
    %c0_i32_0 = arith.constant 0 : i32
    %c0_i32_1 = arith.constant 0 : i32
    return %c0_i32, %c0_i32_0 : i32, i32
  }
  func.func @transform_11(%arg0: i32) -> (i32, i32) {
    %c0_i32 = arith.constant 0 : i32
    %c0_i32_0 = arith.constant 0 : i32
    %c0_i32_1 = arith.constant 0 : i32
    return %c0_i32, %c0_i32_0 : i32, i32
  }
}

</mosaic_0001>

<bundles_post_ra>
// kernel: tpu_custom_call.1
= control target key start
LH: loop header
LB: loop body
LE: loop exit
PB: predicated region body
PF: predicated region fallthrough
CT: control target
= control target key end

     0   :  { %16 = vsyncpa [#allocation5], 0  ;;  %s3054_s0 = inlined_call_operand.hbm [shape: f32[16,16], index: 0, kind: input, shape index: {}]   ;;  %s3055_s1 = inlined_call_operand.vmem [shape: f32[2,2,32], index: 1, kind: input, shape index: {}]   ;;  %s3056_s2 = inlined_call_operand.vmem [shape: f32[2,2,32], index: 2, kind: input, shape index: {}]   ;;  %s3057_s3 = inlined_call_operand.hbm [shape: f32[16,128], index: 3, kind: input, shape index: {}]   ;;  %s3058_s4 = inlined_call_operand.vmem [shape: f32[32,128], index: 4, kind: input, shape index: {}]   ;;  %s3059_s5 = inlined_call_operand.vmem [shape: f32[1,128], index: 5, kind: input, shape index: {}]   ;;  %s3060_s6 = inlined_call_operand.hbm [shape: f32[32,128], index: 6, kind: input, shape index: {}]   ;;  %s3061_s7 = inlined_call_operand.hbm [shape: f32[32,128], index: 7, kind: input, shape index: {}]   ;;  %s3062_s8 = inlined_call_operand.vmem [shape: f32[1,128], index: 8, kind: input, shape index: {}]   ;;  %s3063_s9 = inlined_call_operand.vmem [shape: f32[32,4], index: 9, kind: input, shape index: {}]   ;;  %s3064_s10 = inlined_call_operand.vmem [shape: f32[1,4], index: 10, kind: input, shape index: {}]   ;;  %s3065_s11 = inlined_call_operand.hbm [shape: f32[2,4], index: 11, kind: output, shape index: {}]  }
   0x1   :  { %17 = vsyncpa [#allocation8], 0 }
   0x2   :  { %18 = vsyncpa [#allocation11], 0 }
   0x3   :  { %19 = vsyncpa [#allocation6], 0  ;;  %s2634_s17 = smov [#allocation7]   ;;  %s2635_s19 = smov [#allocation4]  }
   0x4   :  { %s41_s18 = sshll.u32 %s2634_s17, 4  ;;  %s25_s20 = sshll.u32 %s2635_s19, 4  ;;  %s42_s18 = int_to_ptr.vmem [resolvable:$true] %s41_s18  ;;  %s26_s20 = int_to_ptr.vmem [resolvable:$true] %s25_s20 }
   0x5   :  { %s2534_s21 = scalar_lea.vmem %s42_s18, 256  ;;  %p2539_p1 = scmp.lt.s32.totalorder %s42_s18, %s42_s18 }
   0x6   :  { %p2535_p0 = scmp.ne.s32.totalorder %s42_s18, %s2534_s21  ;;  %p2540_p2 = scmp.lt.s32.totalorder %s2534_s21, %s2534_s21 }
   0x8   :  { %p2541_p3 = por %p2540_p2, %p2539_p1 }
   0xa   :  { %p2542_p4 = pnand %p2541_p3, %p2535_p0 }
   0xc   :  { %2545 = shalt.err (!%p2542_p4)
}
   0xd   :  { %s2636_s22 = smov 128   ;;  %s2637_s23 = smov 8  }
   0xe   :  { %47 = dma.hbm_to_vmem [thread:$0]  %s3057_s3, 256, %s42_s18, [#allocation8], %s2636_s22, %s2636_s22, %s2637_s23  }
   0xf   :  { %s2554_s26 = scalar_lea.vmem %s26_s20, 256  ;;  %p2559_p6 = scmp.lt.s32.totalorder %s26_s20, %s26_s20 }
  0x10   :  { %p2555_p5 = scmp.ne.s32.totalorder %s26_s20, %s2554_s26  ;;  %p2560_p7 = scmp.lt.s32.totalorder %s2554_s26, %s2554_s26 }
  0x12   :  { %p2561_p8 = por %p2560_p7, %p2559_p6 }
  0x14   :  { %p2562_p9 = pnand %p2561_p8, %p2555_p5 }
  0x16   :  { %2565 = shalt.err (!%p2562_p9)
}
  0x17   :  { %31 = dma.hbm_to_vmem [thread:$0]  %s3054_s0, 256, %s26_s20, [#allocation5], %s2636_s22, %s2636_s22, %s2637_s23  }
  0x18   :  { %s2638_s29 = smov [#allocation9]   ;;  %s2639_s12 = smov [#allocation10]  }
  0x19   :  { %s57_s30 = sshll.u32 %s2638_s29, 4  ;;  %s69_s13 = sshll.u32 %s2639_s12, 4  ;;  %s58_s30 = int_to_ptr.vmem [resolvable:$true] %s57_s30  ;;  %s70_s13 = int_to_ptr.vmem [resolvable:$true] %s69_s13 }
  0x1a   :  { %s2574_s3 = scalar_lea.vmem %s58_s30, 512  ;;  %p2579_p11 = scmp.lt.s32.totalorder %s58_s30, %s58_s30 }
  0x1b   :  { %p2575_p10 = scmp.ne.s32.totalorder %s58_s30, %s2574_s3  ;;  %p2580_p12 = scmp.lt.s32.totalorder %s2574_s3, %s2574_s3 }
  0x1d   :  { %p2581_p13 = por %p2580_p12, %p2579_p11 }
  0x1f   :  { %p2582_p0 = pnand %p2581_p13, %p2575_p10 }
  0x21   :  { %2585 = shalt.err (!%p2582_p0)
}
  0x22   :  { %63 = dma.hbm_to_vmem [thread:$0]  %s3060_s6, 512, %s58_s30, [#allocation8], %s2636_s22, %s2636_s22, %s2637_s23  }
  0x23   :  { %s2594_s0 = scalar_lea.vmem %s70_s13, 512  ;;  %p2599_p2 = scmp.lt.s32.totalorder %s70_s13, %s70_s13 }
  0x24   :  { %p2595_p1 = scmp.ne.s32.totalorder %s70_s13, %s2594_s0  ;;  %p2600_p3 = scmp.lt.s32.totalorder %s2594_s0, %s2594_s0 }
  0x26   :  { %p2601_p4 = por %p2600_p3, %p2599_p2 }
  0x28   :  { %p2602_p5 = pnand %p2601_p4, %p2595_p1 }
  0x2a   :  { %2605 = shalt.err (!%p2602_p5)
}
  0x2b   :  { %75 = dma.hbm_to_vmem [thread:$0]  %s3061_s7, 512, %s70_s13, [#allocation11], %s2636_s22, %s2636_s22, %s2637_s23  }
  0x2c   :  { %2626 = dma.done.wait [#allocation5], 256  }
  0x2d   :  { %2627 = vsyncadd [#allocation5], 4294967040 }
  0x2e   :  { %2628 = dma.done.wait [#allocation8], 768  }
  0x2f   :  { %2629 = vsyncadd [#allocation8], 4294966528 }
  0x30   :  { %2630 = dma.done.wait [#allocation11], 512  }
  0x31   :  { %2631 = vsyncadd [#allocation11], 4294966784  ;;  %v2640_v0 = vmov 0.0   ;;  %vm2641_vm0 = vmmov 0   ;;  %vm105_vm1 = vcmask 130048   ;;  %v97_v1 = vld [vmem:[#allocation7 + $0x8] sm:$0xff] }
  0x32   :  { %2189 = vmatprep.subr.mxu1 %v2640_v0  ;;  %2197 = vmatprep.mubr.msk.f32.mxu1 %vm2641_vm0, %v2640_v0  ;;  %v96_v2 = vld [vmem:[#allocation7] sm:$0xff]  ;;  %v94_v3 = vld [vmem:[#allocation4] sm:$0xff]  ;;  %v2736_v4 = vld [vmem:[%s3058_s4 + $0x18] sm:$0xff]  ;;  %vm196_vm2 = vcmask 261120   ;;  %s2642_s27 = smov 64   ;;  %vm303_vm3 = vcmask 254976  }
  0x33   :  { %2182 = vmatprep.subr.mxu0 %v97_v1  ;;  %2186 = vmatprep.mubr.msk.f32.mxu0 %vm105_vm1, %v94_v3  ;;  %v2741_v5 = vld [vmem:[%s3058_s4 + $0x10] sm:$0xff]  ;;  %v95_v6 = vld [vmem:[#allocation4 + $0x8] sm:$0xff]  ;;  %v2756_v8 = vld [vmem:[%s3058_s4] sm:$0xff]  ;;  %s2644_s20 = smov [#allocation12]   ;;  %vm2026_vm4 = vcmask 25600  }
  0x34   :  { %2183 = vmatpush3.msra.mxu0 %v97_v1  ;;  %2190 = vmatpush3.msra.mxu1 %v2736_v4  ;;  %v2748_v7 = vld [vmem:[%s3058_s4 + $0x8] sm:$0xff]  ;;  %v193_v9 = vld [vmem:[%s3055_s1] sm:$0x3] }
  0x35   :  { %2184 = vmatprep.subr.mxu0 %v96_v2  ;;  %2191 = vmatprep.subr.mxu1 %v2640_v0  ;;  %v2045_v10 = vld [vmem:[%s3059_s5] ss:$0 sm:$0xff]  ;;  %s2643_s5 = smov 32  }
  0x36   :  { %2185 = vmatpush3.msra.mxu0 %v96_v2  ;;  %2192 = vmatpush3.msra.mxu1 %v2741_v5  ;;  %v194_v20 = vld [vmem:[%s3056_s2] sm:$0x3] }
  0x37   :  { %2187 = vmatmul.mubr.msk.f32.vlgmr.msra.gmra.mxu0 %vm105_vm1, %v95_v6  ;;  %2193 = vmatprep.subr.mxu1 %v2640_v0 }
  0x38   :  { %2194 = vmatpush3.msra.mxu1 %v2748_v7  ;;  %2200 = vmatprep.subr.mxu0 %v2640_v0 }
  0x39   :  { %2195 = vmatprep.subr.mxu1 %v2640_v0  ;;  %2201 = vmatpush3.msra.mxu0 %v2736_v4 }
  0x3a   :  { %2196 = vmatpush3.msra.mxu1 %v2756_v8  ;;  %2202 = vmatprep.subr.mxu0 %v2640_v0 }
  0x3b   :  { %2198 = vmatmul.mubr.msk.f32.vlgmr.msra.gmra.mxu1 %vm196_vm2, %v193_v9  ;;  %2203 = vmatpush3.msra.mxu0 %v2741_v5 }
  0x3c   :  { %2204 = vmatprep.subr.mxu0 %v2640_v0  ;;  %2208 = vmatprep.mubr.msk.f32.mxu0 %vm2641_vm0, %v2640_v0 }
  0x3d   :  { %2205 = vmatpush3.msra.mxu0 %v2748_v7  ;;  %2211 = vmatprep.subr.mxu1 %v2640_v0 }
  0x3e   :  { %2206 = vmatprep.subr.mxu0 %v2640_v0  ;;  %2212 = vmatpush3.msra.mxu1 %v2736_v4 }
  0x3f   :  { %2207 = vmatpush3.msra.mxu0 %v2756_v8  ;;  %2213 = vmatprep.subr.mxu1 %v2640_v0 }
  0x40   :  { %2214 = vmatpush3.msra.mxu1 %v2741_v5  ;;  %2219 = vmatprep.mubr.msk.f32.mxu1 %vm2641_vm0, %v2640_v0 }
  0x41   :  { %2215 = vmatprep.subr.mxu1 %v2640_v0  ;;  %2222 = vmatprep.subr.mxu0 %v2640_v0 }
  0x42   :  { %2216 = vmatpush3.msra.mxu1 %v2748_v7 }
  0x43   :  { %2217 = vmatprep.subr.mxu1 %v2640_v0 }
  0x44   :  { %2218 = vmatpush3.msra.mxu1 %v2756_v8 }
  0x45   :  { %2233 = vmatprep.subr.mxu1 %v2640_v0 }
  0xf7   :  { %v2188_v11 = vpop.f32.mrf.mxu0 }
  0xf8   :  { %v184_v12 = vadd.f32 %v2188_v11, %v2045_v10 }
  0xf9   :  { %v178_v13 = vpop.f32.mrf.mxu0 }
  0xfa   :  { %188 = vst [vmem:[#allocation3 + $0x8] sm:$0xff] %v184_v12  ;;  %v179_v14 = vadd.f32 %v2045_v10, %v178_v13 }
  0xfb   :  { %v266_v15 = vpop.f32.mrf.mxu1 }
  0xfc   :  { %187 = vst [vmem:[#allocation3] sm:$0xff] %v179_v14 }
  0xfd   :  { %v2199_v16 = vpop.f32.mrf.mxu1 }
 0x103   :  { %v195_v17 = vld [vmem:[#allocation3] sm:$0x3]  ;;  %v305_v35 = vld [vmem:[#allocation3 + $0x2] sm:$0x3]  ;;  %v408_v53 = vld [vmem:[#allocation3 + $0x4] sm:$0x3] }
 0x104   :  { %v270_v18 = vadd.f32 %v266_v15, %v195_v17  ;;  %v511_v12 = vld [vmem:[#allocation3 + $0x6] sm:$0x3] }
 0x106   :  { %2398 = vtanh.f32 %v270_v18  ;;  %v2049_v21 = vmul.f32 -1.442695, %v270_v18 }
 0x108   :  { %2400 = vpow2.f32 %v2049_v21 }
 0x113   :  { %v2399_v19 = vpop.eup %2398 }
 0x114   :  { %284 = vrot.lane.b32.xlu0 %v2399_v19, %s2642_s27 }
 0x115   :  { %v2401_v22 = vpop.eup %2400 }
 0x116   :  { %v274_v23 = vadd.f32 1.0, %v2401_v22 }
 0x118   :  { %279 = vrot.lane.b32.xlu0 %v194_v20, %s2643_s5  ;;  %2402 = vrcp.f32 %v274_v23 }
 0x125   :  { %v2403_v24 = vpop.eup %2402 }
 0x186   :  { %v285_v25 = vpop.permute.xlu0 %284 }
 0x187   :  { %v287_v26 = vmul.f32 %v2403_v24, %v285_v25 }
 0x189   :  { %289 = vrot.lane.b32.xlu1 %v287_v26, %s2643_s5 }
 0x18a   :  { %v280_v27 = vpop.permute.xlu0 %279 }
 0x18b   :  { %v282_v28 = vmul.f32 %v2403_v24, %v280_v27 }
 0x1fb   :  { %v290_v29 = vpop.permute.xlu1 %289 }
 0x1fc   :  { %v292_v30 = vadd.f32 %v290_v29, %v282_v28 }
 0x1fe   :  { %2404 = vtanh.f32 %v292_v30 }
 0x20b   :  { %v2405_v31 = vpop.eup %2404 }
 0x20c   :  { %295 = vrot.lane.b32.xlu1 %v2405_v31, %s2642_s27 }
 0x27e   :  { %v296_v32 = vpop.permute.xlu1 %295 }
 0x27f   :  { %v298_v33 = vmul.f32 %v2403_v24, %v296_v32 }
 0x281   :  { %300 = vrot.lane.b32.xlu0 %v298_v33, %s2643_s5 }
 0x2f3   :  { %v301_v34 = vpop.permute.xlu0 %300 }
 0x2f4   :  { %304 = vst.msk [vmem:[#allocation2] sm:$0x3] %vm303_vm3, %v301_v34  ;;  %2209 = vmatmul.mubr.msk.f32.vlgmr.msra.gmra.mxu0 %vm196_vm2, %v301_v34 }
 0x2f5   :  { %2223 = vmatpush3.msra.mxu0 %v2736_v4  ;;  %2230 = vmatprep.mubr.msk.f32.mxu0 %vm2641_vm0, %v2640_v0 }
 0x2f6   :  { %2224 = vmatprep.subr.mxu0 %v2640_v0 }
 0x2f7   :  { %2225 = vmatpush3.msra.mxu0 %v2741_v5 }
 0x2f8   :  { %2226 = vmatprep.subr.mxu0 %v2640_v0 }
 0x2f9   :  { %2227 = vmatpush3.msra.mxu0 %v2748_v7 }
 0x2fa   :  { %2228 = vmatprep.subr.mxu0 %v2640_v0 }
 0x2fb   :  { %2229 = vmatpush3.msra.mxu0 %v2756_v8 }
 0x2fc   :  { %2244 = vmatprep.subr.mxu0 %v2640_v0 }
 0x3b4   :  { %v374_v36 = vpop.f32.mrf.mxu0 }
 0x3b5   :  { %v378_v37 = vadd.f32 %v374_v36, %v305_v35 }
 0x3b6   :  { %v2210_v38 = vpop.f32.mrf.mxu0 }
 0x3b7   :  { %2406 = vtanh.f32 %v378_v37  ;;  %v2051_v40 = vmul.f32 -1.442695, %v378_v37 }
 0x3b9   :  { %2408 = vpow2.f32 %v2051_v40 }
 0x3c4   :  { %v2407_v39 = vpop.eup %2406 }
 0x3c5   :  { %388 = vrot.lane.b32.xlu1 %v2407_v39, %s2642_s27 }
 0x3c6   :  { %v2409_v41 = vpop.eup %2408 }
 0x3c7   :  { %v382_v42 = vadd.f32 1.0, %v2409_v41 }
 0x3c9   :  { %2410 = vrcp.f32 %v382_v42 }
 0x3d6   :  { %v2411_v43 = vpop.eup %2410 }
 0x3d7   :  { %v386_v46 = vmul.f32 %v2411_v43, %v292_v30  ;;  %v614_v30 = vld [vmem:[#allocation3 + $0x8] sm:$0x3] }
 0x437   :  { %v389_v44 = vpop.permute.xlu1 %388 }
 0x438   :  { %v391_v45 = vmul.f32 %v2411_v43, %v389_v44 }
 0x43a   :  { %393 = vrot.lane.b32.xlu0 %v391_v45, %s2643_s5 }
 0x4ac   :  { %v394_v47 = vpop.permute.xlu0 %393 }
 0x4ad   :  { %v396_v48 = vadd.f32 %v394_v47, %v386_v46 }
 0x4af   :  { %2412 = vtanh.f32 %v396_v48 }
 0x4bc   :  { %v2413_v49 = vpop.eup %2412 }
 0x4bd   :  { %399 = vrot.lane.b32.xlu1 %v2413_v49, %s2642_s27 }
 0x52f   :  { %v400_v50 = vpop.permute.xlu1 %399 }
 0x530   :  { %v402_v51 = vmul.f32 %v2411_v43, %v400_v50 }
 0x532   :  { %404 = vrot.lane.b32.xlu0 %v402_v51, %s2643_s5 }
 0x5a4   :  { %v405_v52 = vpop.permute.xlu0 %404 }
 0x5a5   :  { %407 = vst.msk [vmem:[#allocation2 + $0x2] sm:$0x3] %vm303_vm3, %v405_v52  ;;  %2220 = vmatmul.mubr.msk.f32.vlgmr.msra.gmra.mxu1 %vm196_vm2, %v405_v52 }
 0x5a6   :  { %2234 = vmatpush3.msra.mxu1 %v2736_v4  ;;  %2241 = vmatprep.mubr.msk.f32.mxu1 %vm2641_vm0, %v2640_v0 }
 0x5a7   :  { %2235 = vmatprep.subr.mxu1 %v2640_v0 }
 0x5a8   :  { %2236 = vmatpush3.msra.mxu1 %v2741_v5 }
 0x5a9   :  { %2237 = vmatprep.subr.mxu1 %v2640_v0 }
 0x5aa   :  { %2238 = vmatpush3.msra.mxu1 %v2748_v7 }
 0x5ab   :  { %2239 = vmatprep.subr.mxu1 %v2640_v0 }
 0x5ac   :  { %2240 = vmatpush3.msra.mxu1 %v2756_v8 }
 0x5ad   :  { %2255 = vmatprep.subr.mxu1 %v2640_v0 }
 0x665   :  { %v477_v54 = vpop.f32.mrf.mxu1 }
 0x666   :  { %v481_v55 = vadd.f32 %v477_v54, %v408_v53 }
 0x667   :  { %v2221_v56 = vpop.f32.mrf.mxu1 }
 0x668   :  { %2414 = vtanh.f32 %v481_v55  ;;  %v2053_v58 = vmul.f32 -1.442695, %v481_v55 }
 0x66a   :  { %2416 = vpow2.f32 %v2053_v58 }
 0x675   :  { %v2415_v57 = vpop.eup %2414 }
 0x676   :  { %491 = vrot.lane.b32.xlu1 %v2415_v57, %s2642_s27 }
 0x677   :  { %v2417_v59 = vpop.eup %2416 }
 0x678   :  { %v485_v60 = vadd.f32 1.0, %v2417_v59 }
 0x67a   :  { %2418 = vrcp.f32 %v485_v60 }
 0x687   :  { %v2419_v61 = vpop.eup %2418 }
 0x688   :  { %v489_v1 = vmul.f32 %v2419_v61, %v396_v48  ;;  %v717_v48 = vld [vmem:[#allocation3 + $0xa] sm:$0x3] }
 0x6e8   :  { %v492_v62 = vpop.permute.xlu1 %491 }
 0x6e9   :  { %v494_v63 = vmul.f32 %v2419_v61, %v492_v62 }
 0x6eb   :  { %496 = vrot.lane.b32.xlu0 %v494_v63, %s2643_s5  ;;  %v820_v63 = vld [vmem:[#allocation3 + $0xc] sm:$0x3] }
 0x75d   :  { %v497_v2 = vpop.permute.xlu0 %496 }
 0x75e   :  { %v499_v3 = vadd.f32 %v497_v2, %v489_v1 }
 0x760   :  { %2420 = vtanh.f32 %v499_v3 }
 0x76d   :  { %v2421_v6 = vpop.eup %2420 }
 0x76e   :  { %502 = vrot.lane.b32.xlu1 %v2421_v6, %s2642_s27 }
 0x7e0   :  { %v503_v9 = vpop.permute.xlu1 %502 }
 0x7e1   :  { %v505_v10 = vmul.f32 %v2419_v61, %v503_v9 }
 0x7e3   :  { %507 = vrot.lane.b32.xlu0 %v505_v10, %s2643_s5 }
 0x855   :  { %v508_v11 = vpop.permute.xlu0 %507 }
 0x856   :  { %510 = vst.msk [vmem:[#allocation2 + $0x4] sm:$0x3] %vm303_vm3, %v508_v11  ;;  %2231 = vmatmul.mubr.msk.f32.vlgmr.msra.gmra.mxu0 %vm196_vm2, %v508_v11 }
 0x857   :  { %2245 = vmatpush3.msra.mxu0 %v2736_v4  ;;  %2252 = vmatprep.mubr.msk.f32.mxu0 %vm2641_vm0, %v2640_v0 }
 0x858   :  { %2246 = vmatprep.subr.mxu0 %v2640_v0 }
 0x859   :  { %2247 = vmatpush3.msra.mxu0 %v2741_v5 }
 0x85a   :  { %2248 = vmatprep.subr.mxu0 %v2640_v0 }
 0x85b   :  { %2249 = vmatpush3.msra.mxu0 %v2748_v7 }
 0x85c   :  { %2250 = vmatprep.subr.mxu0 %v2640_v0 }
 0x85d   :  { %2251 = vmatpush3.msra.mxu0 %v2756_v8 }
 0x85e   :  { %2266 = vmatprep.subr.mxu0 %v2640_v0 }
 0x916   :  { %v580_v13 = vpop.f32.mrf.mxu0 }
 0x917   :  { %v584_v14 = vadd.f32 %v580_v13, %v511_v12 }
 0x918   :  { %v2232_v15 = vpop.f32.mrf.mxu0 }
 0x919   :  { %2422 = vtanh.f32 %v584_v14  ;;  %v2055_v17 = vmul.f32 -1.442695, %v584_v14 }
 0x91b   :  { %2424 = vpow2.f32 %v2055_v17 }
 0x926   :  { %v2423_v16 = vpop.eup %2422 }
 0x927   :  { %594 = vrot.lane.b32.xlu1 %v2423_v16, %s2642_s27 }
 0x928   :  { %v2425_v18 = vpop.eup %2424 }
 0x929   :  { %v588_v19 = vadd.f32 1.0, %v2425_v18 }
 0x92b   :  { %2426 = vrcp.f32 %v588_v19 }
 0x938   :  { %v2427_v20 = vpop.eup %2426 }
 0x939   :  { %v592_v23 = vmul.f32 %v2427_v20, %v499_v3 }
 0x999   :  { %v595_v21 = vpop.permute.xlu1 %594 }
 0x99a   :  { %v597_v22 = vmul.f32 %v2427_v20, %v595_v21 }
 0x99c   :  { %599 = vrot.lane.b32.xlu0 %v597_v22, %s2643_s5  ;;  %v923_v22 = vld [vmem:[#allocation3 + $0xe] sm:$0x3] }
 0xa0e   :  { %v600_v24 = vpop.permute.xlu0 %599 }
 0xa0f   :  { %v602_v25 = vadd.f32 %v600_v24, %v592_v23 }
 0xa11   :  { %2428 = vtanh.f32 %v602_v25 }
 0xa1e   :  { %v2429_v26 = vpop.eup %2428 }
 0xa1f   :  { %605 = vrot.lane.b32.xlu1 %v2429_v26, %s2642_s27 }
 0xa91   :  { %v606_v27 = vpop.permute.xlu1 %605 }
 0xa92   :  { %v608_v28 = vmul.f32 %v2427_v20, %v606_v27 }
 0xa94   :  { %610 = vrot.lane.b32.xlu0 %v608_v28, %s2643_s5 }
 0xb06   :  { %v611_v29 = vpop.permute.xlu0 %610 }
 0xb07   :  { %613 = vst.msk [vmem:[#allocation2 + $0x6] sm:$0x3] %vm303_vm3, %v611_v29  ;;  %2242 = vmatmul.mubr.msk.f32.vlgmr.msra.gmra.mxu1 %vm196_vm2, %v611_v29 }
 0xb08   :  { %2256 = vmatpush3.msra.mxu1 %v2736_v4  ;;  %2263 = vmatprep.mubr.msk.f32.mxu1 %vm2641_vm0, %v2640_v0 }
 0xb09   :  { %2257 = vmatprep.subr.mxu1 %v2640_v0 }
 0xb0a   :  { %2258 = vmatpush3.msra.mxu1 %v2741_v5 }
 0xb0b   :  { %2259 = vmatprep.subr.mxu1 %v2640_v0 }
 0xb0c   :  { %2260 = vmatpush3.msra.mxu1 %v2748_v7 }
 0xb0d   :  { %2261 = vmatprep.subr.mxu1 %v2640_v0 }
 0xb0e   :  { %2262 = vmatpush3.msra.mxu1 %v2756_v8  ;;  %v1026_v62 = vld [vmem:[#allocation2] sm:$0xff] }
 0xbc7   :  { %v683_v31 = vpop.f32.mrf.mxu1 }
 0xbc8   :  { %v687_v32 = vadd.f32 %v683_v31, %v614_v30 }
 0xbc9   :  { %v2243_v33 = vpop.f32.mrf.mxu1 }
 0xbca   :  { %2430 = vtanh.f32 %v687_v32  ;;  %v2057_v35 = vmul.f32 -1.442695, %v687_v32 }
 0xbcc   :  { %2432 = vpow2.f32 %v2057_v35 }
 0xbd7   :  { %v2431_v34 = vpop.eup %2430 }
 0xbd8   :  { %697 = vrot.lane.b32.xlu1 %v2431_v34, %s2642_s27 }
 0xbd9   :  { %v2433_v36 = vpop.eup %2432 }
 0xbda   :  { %v691_v37 = vadd.f32 1.0, %v2433_v36 }
 0xbdc   :  { %2434 = vrcp.f32 %v691_v37  ;;  %v1031_v37 = vld [vmem:[#allocation9 + $0x18] sm:$0xff] }
 0xbdd   :  { %2277 = vmatprep.subr.mxu1 %v1031_v37 }
 0xbe9   :  { %v2435_v38 = vpop.eup %2434 }
 0xbea   :  { %v695_v41 = vmul.f32 %v2435_v38, %v602_v25 }
 0xc4a   :  { %v698_v39 = vpop.permute.xlu1 %697 }
 0xc4b   :  { %v700_v40 = vmul.f32 %v2435_v38, %v698_v39  ;;  %v1029_v39 = vld [vmem:[#allocation9 + $0x8] sm:$0xff] }
 0xc4d   :  { %702 = vrot.lane.b32.xlu0 %v700_v40, %s2643_s5  ;;  %v1028_v40 = vld [vmem:[#allocation9] sm:$0xff] }
 0xcbf   :  { %v703_v42 = vpop.permute.xlu0 %702 }
 0xcc0   :  { %v705_v43 = vadd.f32 %v703_v42, %v695_v41  ;;  %v2891_v41 = vld [vmem:[#allocation10 + $0x18] sm:$0xff]  ;;  %v2893_v42 = vld [vmem:[#allocation10 + $0x10] sm:$0xff] }
 0xcc2   :  { %2436 = vtanh.f32 %v705_v43 }
 0xccf   :  { %v2437_v44 = vpop.eup %2436 }
 0xcd0   :  { %708 = vrot.lane.b32.xlu1 %v2437_v44, %s2642_s27  ;;  %v2898_v44 = vld [vmem:[#allocation10 + $0x8] sm:$0xff] }
 0xd42   :  { %v709_v45 = vpop.permute.xlu1 %708 }
 0xd43   :  { %v711_v46 = vmul.f32 %v2435_v38, %v709_v45  ;;  %v1030_v38 = vld [vmem:[#allocation9 + $0x10] sm:$0xff] }
 0xd45   :  { %713 = vrot.lane.b32.xlu0 %v711_v46, %s2643_s5  ;;  %v2902_v46 = vld [vmem:[#allocation10] sm:$0xff] }
 0xdb7   :  { %v714_v47 = vpop.permute.xlu0 %713 }
 0xdb8   :  { %716 = vst.msk [vmem:[#allocation2 + $0x8] sm:$0x3] %vm303_vm3, %v714_v47  ;;  %2253 = vmatmul.mubr.msk.f32.vlgmr.msra.gmra.mxu0 %vm196_vm2, %v714_v47  ;;  %v2067_v47 = vld [vmem:[%s3055_s1 + $0x2] sm:$0x3] }
 0xdb9   :  { %2267 = vmatpush3.msra.mxu0 %v2736_v4  ;;  %2274 = vmatprep.mubr.msk.f32.mxu0 %vm2641_vm0, %v2640_v0 }
 0xdba   :  { %2268 = vmatprep.subr.mxu0 %v2640_v0 }
 0xdbb   :  { %2269 = vmatpush3.msra.mxu0 %v2741_v5 }
 0xdbc   :  { %2270 = vmatprep.subr.mxu0 %v2640_v0 }
 0xdbd   :  { %2271 = vmatpush3.msra.mxu0 %v2748_v7 }
 0xdbe   :  { %2272 = vmatprep.subr.mxu0 %v2640_v0 }
 0xdbf   :  { %2273 = vmatpush3.msra.mxu0 %v2756_v8 }
 0xdc0   :  { %2288 = vmatprep.subr.mxu0 %v2640_v0 }
 0xe78   :  { %v786_v49 = vpop.f32.mrf.mxu0 }
 0xe79   :  { %v790_v4 = vadd.f32 %v786_v49, %v717_v48  ;;  %v2068_v48 = vld [vmem:[%s3056_s2 + $0x2] sm:$0x3] }
 0xe7a   :  { %v2254_v50 = vpop.f32.mrf.mxu0 }
 0xe7b   :  { %2438 = vtanh.f32 %v790_v4  ;;  %v2059_v52 = vmul.f32 -1.442695, %v790_v4 }
 0xe7d   :  { %2440 = vpow2.f32 %v2059_v52  ;;  %v2064_v52 = vld [vmem:[%s3062_s8] ss:$0 sm:$0xff] }
 0xe88   :  { %v2439_v51 = vpop.eup %2438 }
 0xe89   :  { %800 = vrot.lane.b32.xlu1 %v2439_v51, %s2642_s27 }
 0xe8a   :  { %v2441_v5 = vpop.eup %2440 }
 0xe8b   :  { %v794_v53 = vadd.f32 1.0, %v2441_v5 }
 0xe8d   :  { %2442 = vrcp.f32 %v794_v53 }
 0xe9a   :  { %v2443_v7 = vpop.eup %2442 }
 0xe9b   :  { %v798_v8 = vmul.f32 %v2443_v7, %v705_v43 }
 0xefb   :  { %v801_v54 = vpop.permute.xlu1 %800 }
 0xefc   :  { %v803_v55 = vmul.f32 %v2443_v7, %v801_v54 }
 0xefe   :  { %805 = vrot.lane.b32.xlu0 %v803_v55, %s2643_s5 }
 0xf70   :  { %v806_v56 = vpop.permute.xlu0 %805 }
 0xf71   :  { %v808_v57 = vadd.f32 %v806_v56, %v798_v8 }
 0xf73   :  { %2444 = vtanh.f32 %v808_v57 }
 0xf80   :  { %v2445_v58 = vpop.eup %2444 }
 0xf81   :  { %811 = vrot.lane.b32.xlu1 %v2445_v58, %s2642_s27 }
 0xff3   :  { %v812_v59 = vpop.permute.xlu1 %811 }
 0xff4   :  { %v814_v60 = vmul.f32 %v2443_v7, %v812_v59 }
 0xff6   :  { %816 = vrot.lane.b32.xlu0 %v814_v60, %s2643_s5 }
0x1068   :  { %v817_v61 = vpop.permute.xlu0 %816 }
0x1069   :  { %819 = vst.msk [vmem:[#allocation2 + $0xa] sm:$0x3] %vm303_vm3, %v817_v61  ;;  %2264 = vmatmul.mubr.msk.f32.vlgmr.msra.gmra.mxu1 %vm196_vm2, %v817_v61 }
0x106a   :  { %2285 = vmatprep.mubr.msk.f32.mxu1 %vm196_vm2, %v1026_v62  ;;  %2278 = vmatpush3.msra.mxu1 %v1031_v37 }
0x106b   :  { %2279 = vmatprep.subr.mxu1 %v1030_v38 }
0x106c   :  { %2280 = vmatpush3.msra.mxu1 %v1030_v38 }
0x106d   :  { %2281 = vmatprep.subr.mxu1 %v1029_v39 }
0x106e   :  { %2282 = vmatpush3.msra.mxu1 %v1029_v39 }
0x106f   :  { %2283 = vmatprep.subr.mxu1 %v1028_v40 }
0x1070   :  { %2284 = vmatpush3.msra.mxu1 %v1028_v40 }
0x1071   :  { %2299 = vmatprep.subr.mxu1 %v2640_v0 }
0x1129   :  { %v889_v1 = vpop.f32.mrf.mxu1 }
0x112a   :  { %v893_v2 = vadd.f32 %v889_v1, %v820_v63 }
0x112b   :  { %v2265_v3 = vpop.f32.mrf.mxu1 }
0x112c   :  { %2446 = vtanh.f32 %v893_v2  ;;  %v2061_v9 = vmul.f32 -1.442695, %v893_v2 }
0x112e   :  { %2448 = vpow2.f32 %v2061_v9 }
0x1139   :  { %v2447_v6 = vpop.eup %2446 }
0x113a   :  { %903 = vrot.lane.b32.xlu1 %v2447_v6, %s2642_s27 }
0x113b   :  { %v2449_v10 = vpop.eup %2448 }
0x113c   :  { %v897_v11 = vadd.f32 1.0, %v2449_v10 }
0x113e   :  { %2450 = vrcp.f32 %v897_v11 }
0x114b   :  { %v2451_v12 = vpop.eup %2450 }
0x114c   :  { %v901_v15 = vmul.f32 %v2451_v12, %v808_v57 }
0x11ac   :  { %v904_v13 = vpop.permute.xlu1 %903 }
0x11ad   :  { %v906_v14 = vmul.f32 %v2451_v12, %v904_v13 }
0x11af   :  { %908 = vrot.lane.b32.xlu0 %v906_v14, %s2643_s5 }
0x1221   :  { %v909_v16 = vpop.permute.xlu0 %908 }
0x1222   :  { %v911_v17 = vadd.f32 %v909_v16, %v901_v15 }
0x1224   :  { %2452 = vtanh.f32 %v911_v17 }
0x1231   :  { %v2453_v18 = vpop.eup %2452 }
0x1232   :  { %914 = vrot.lane.b32.xlu1 %v2453_v18, %s2642_s27 }
0x12a4   :  { %v915_v19 = vpop.permute.xlu1 %914 }
0x12a5   :  { %v917_v20 = vmul.f32 %v2451_v12, %v915_v19 }
0x12a7   :  { %919 = vrot.lane.b32.xlu0 %v917_v20, %s2643_s5 }
0x1319   :  { %v920_v21 = vpop.permute.xlu0 %919 }
0x131a   :  { %922 = vst.msk [vmem:[#allocation2 + $0xc] sm:$0x3] %vm303_vm3, %v920_v21  ;;  %2275 = vmatmul.mubr.msk.f32.vlgmr.msra.gmra.mxu0 %vm196_vm2, %v920_v21 }
0x131b   :  { %2296 = vmatprep.mubr.msk.f32.mxu0 %vm2641_vm0, %v2640_v0  ;;  %2289 = vmatpush3.msra.mxu0 %v2891_v41 }
0x131c   :  { %2290 = vmatprep.subr.mxu0 %v2640_v0 }
0x131d   :  { %2291 = vmatpush3.msra.mxu0 %v2893_v42 }
0x131e   :  { %2292 = vmatprep.subr.mxu0 %v2640_v0 }
0x131f   :  { %2293 = vmatpush3.msra.mxu0 %v2898_v44 }
0x1320   :  { %2294 = vmatprep.subr.mxu0 %v2640_v0 }
0x1321   :  { %2295 = vmatpush3.msra.mxu0 %v2902_v46 }
0x1322   :  { %2297 = vmatmul.mubr.msk.f32.vlgmr.msra.gmra.mxu0 %vm196_vm2, %v2067_v47  ;;  %2310 = vmatprep.subr.mxu0 %v2640_v0 }
0x1323   :  { %2311 = vmatpush3.msra.mxu0 %v2891_v41  ;;  %2318 = vmatprep.mubr.msk.f32.mxu0 %vm2641_vm0, %v2640_v0 }
0x1324   :  { %2312 = vmatprep.subr.mxu0 %v2640_v0 }
0x1325   :  { %2313 = vmatpush3.msra.mxu0 %v2893_v42 }
0x1326   :  { %2314 = vmatprep.subr.mxu0 %v2640_v0 }
0x1327   :  { %2315 = vmatpush3.msra.mxu0 %v2898_v44 }
0x1328   :  { %2316 = vmatprep.subr.mxu0 %v2640_v0 }
0x1329   :  { %2317 = vmatpush3.msra.mxu0 %v2902_v46 }
0x132a   :  { %2332 = vmatprep.subr.mxu0 %v2640_v0 }
0x13da   :  { %v992_v23 = vpop.f32.mrf.mxu0 }
0x13db   :  { %v996_v24 = vadd.f32 %v992_v23, %v923_v22 }
0x13dc   :  { %v2276_v25 = vpop.f32.mrf.mxu0 }
0x13dd   :  { %2454 = vtanh.f32 %v996_v24  ;;  %v2063_v27 = vmul.f32 -1.442695, %v996_v24 }
0x13df   :  { %2456 = vpow2.f32 %v2063_v27 }
0x13e2   :  { %v1200_v50 = vpop.f32.mrf.mxu0 }
0x13e4   :  { %v2298_v51 = vpop.f32.mrf.mxu0 }
0x13ea   :  { %v2455_v26 = vpop.eup %2454 }
0x13eb   :  { %1006 = vrot.lane.b32.xlu1 %v2455_v26, %s2642_s27 }
0x13ec   :  { %v2457_v28 = vpop.eup %2456 }
0x13ed   :  { %v1000_v29 = vadd.f32 1.0, %v2457_v28 }
0x13ef   :  { %2458 = vrcp.f32 %v1000_v29 }
0x13fc   :  { %v2459_v30 = vpop.eup %2458 }
0x13fd   :  { %v1004_v33 = vmul.f32 %v2459_v30, %v911_v17 }
0x145d   :  { %v1007_v31 = vpop.permute.xlu1 %1006 }
0x145e   :  { %v1009_v32 = vmul.f32 %v2459_v30, %v1007_v31 }
0x1460   :  { %1011 = vrot.lane.b32.xlu0 %v1009_v32, %s2643_s5 }
0x14d2   :  { %v1012_v34 = vpop.permute.xlu0 %1011 }
0x14d3   :  { %v1014_v35 = vadd.f32 %v1012_v34, %v1004_v33 }
0x14d5   :  { %2460 = vtanh.f32 %v1014_v35 }
0x14e2   :  { %v2461_v36 = vpop.eup %2460 }
0x14e3   :  { %1017 = vrot.lane.b32.xlu1 %v2461_v36, %s2642_s27 }
0x1555   :  { %v1018_v43 = vpop.permute.xlu1 %1017 }
0x1556   :  { %v1020_v45 = vmul.f32 %v2459_v30, %v1018_v43 }
0x1558   :  { %1022 = vrot.lane.b32.xlu0 %v1020_v45, %s2643_s5 }
0x155c   :  { %1213 = vrot.lane.b32.xlu0 %v2068_v48, %s2643_s5 }
0x15ca   :  { %v1023_v49 = vpop.permute.xlu0 %1022 }
0x15cb   :  { %1025 = vst.msk [vmem:[#allocation2 + $0xe] sm:$0x3] %vm303_vm3, %v1023_v49 }
0x15ce   :  { %v1214_v63 = vpop.permute.xlu0 %1213 }
0x15d2   :  { %v1027_v4 = vld [vmem:[#allocation2 + $0x8] sm:$0xff] }
0x15d3   :  { %2286 = vmatmul.mubr.msk.f32.vlgmr.msra.gmra.mxu1 %vm196_vm2, %v1027_v4 }
0x15d4   :  { %2300 = vmatpush3.msra.mxu1 %v2891_v41  ;;  %2307 = vmatprep.mubr.msk.f32.mxu1 %vm2641_vm0, %v2640_v0 }
0x15d5   :  { %2301 = vmatprep.subr.mxu1 %v2640_v0 }
0x15d6   :  { %2302 = vmatpush3.msra.mxu1 %v2893_v42 }
0x15d7   :  { %2303 = vmatprep.subr.mxu1 %v2640_v0 }
0x15d8   :  { %2304 = vmatpush3.msra.mxu1 %v2898_v44 }
0x15d9   :  { %2305 = vmatprep.subr.mxu1 %v2640_v0 }
0x15da   :  { %2306 = vmatpush3.msra.mxu1 %v2902_v46 }
0x15db   :  { %2321 = vmatprep.subr.mxu1 %v2640_v0 }
0x1693   :  { %v2287_v5 = vpop.f32.mrf.mxu1 }
0x1694   :  { %v1117_v53 = vadd.f32 %v2287_v5, %v2064_v52 }
0x1695   :  { %v1111_v7 = vpop.f32.mrf.mxu1 }
0x1696   :  { %1121 = vst [vmem:[#allocation3 + $0x8] sm:$0xff] %v1117_v53  ;;  %v1112_v54 = vadd.f32 %v2064_v52, %v1111_v7 }
0x1698   :  { %1120 = vst [vmem:[#allocation3] sm:$0xff] %v1112_v54 }
0x169f   :  { %v1130_v55 = vld [vmem:[#allocation3] sm:$0x3]  ;;  %v1233_v12 = vld [vmem:[#allocation3 + $0x2] sm:$0x3]  ;;  %v1334_v30 = vld [vmem:[#allocation3 + $0x4] sm:$0x3] }
0x16a0   :  { %v1204_v8 = vadd.f32 %v1200_v50, %v1130_v55  ;;  %v1435_v51 = vld [vmem:[#allocation3 + $0x6] sm:$0x3] }
0x16a2   :  { %2462 = vtanh.f32 %v1204_v8  ;;  %v2070_v57 = vmul.f32 -1.442695, %v1204_v8 }
0x16a4   :  { %2464 = vpow2.f32 %v2070_v57 }
0x16af   :  { %v2463_v56 = vpop.eup %2462 }
0x16b0   :  { %1218 = vrot.lane.b32.xlu1 %v2463_v56, %s2642_s27 }
0x16b1   :  { %v2465_v58 = vpop.eup %2464 }
0x16b2   :  { %v1208_v59 = vadd.f32 1.0, %v2465_v58 }
0x16b4   :  { %2466 = vrcp.f32 %v1208_v59 }
0x16c1   :  { %v2467_v60 = vpop.eup %2466 }
0x16c2   :  { %v1216_v1 = vmul.f32 %v2467_v60, %v1214_v63 }
0x1722   :  { %v1219_v61 = vpop.permute.xlu1 %1218 }
0x1723   :  { %v1221_v62 = vmul.f32 %v2467_v60, %v1219_v61 }
0x1725   :  { %1223 = vrot.lane.b32.xlu1 %v1221_v62, %s2643_s5 }
0x1797   :  { %v1224_v2 = vpop.permute.xlu1 %1223 }
0x1798   :  { %v1226_v3 = vadd.f32 %v1224_v2, %v1216_v1 }
0x179a   :  { %2468 = vtanh.f32 %v1226_v3 }
0x17a7   :  { %v2469_v6 = vpop.eup %2468 }
0x17a8   :  { %1229 = vrot.lane.b32.xlu0 %v2469_v6, %s2642_s27 }
0x181a   :  { %v1230_v9 = vpop.permute.xlu0 %1229 }
0x181b   :  { %v1232_v10 = vmul.f32 %v2467_v60, %v1230_v9 }
0x181d   :  { %1235 = vrot.lane.b32.xlu1 %v1232_v10, %s2643_s5 }
0x188f   :  { %v1236_v11 = vpop.permute.xlu1 %1235 }
0x1890   :  { %2308 = vmatmul.mubr.msk.f32.vlgmr.msra.gmra.mxu1 %vm196_vm2, %v1236_v11 }
0x1891   :  { %2322 = vmatpush3.msra.mxu1 %v2891_v41  ;;  %2329 = vmatprep.mubr.msk.f32.mxu1 %vm2641_vm0, %v2640_v0 }
0x1892   :  { %2323 = vmatprep.subr.mxu1 %v2640_v0 }
0x1893   :  { %2324 = vmatpush3.msra.mxu1 %v2893_v42 }
0x1894   :  { %2325 = vmatprep.subr.mxu1 %v2640_v0 }
0x1895   :  { %2326 = vmatpush3.msra.mxu1 %v2898_v44 }
0x1896   :  { %2327 = vmatprep.subr.mxu1 %v2640_v0 }
0x1897   :  { %2328 = vmatpush3.msra.mxu1 %v2902_v46 }
0x1898   :  { %2343 = vmatprep.subr.mxu1 %v2640_v0 }
0x1950   :  { %v1305_v13 = vpop.f32.mrf.mxu1 }
0x1951   :  { %v1309_v14 = vadd.f32 %v1305_v13, %v1233_v12 }
0x1952   :  { %v2309_v15 = vpop.f32.mrf.mxu1 }
0x1953   :  { %2470 = vtanh.f32 %v1309_v14  ;;  %v2072_v17 = vmul.f32 -1.442695, %v1309_v14 }
0x1955   :  { %2472 = vpow2.f32 %v2072_v17 }
0x1960   :  { %v2471_v16 = vpop.eup %2470 }
0x1961   :  { %1319 = vrot.lane.b32.xlu0 %v2471_v16, %s2642_s27 }
0x1962   :  { %v2473_v18 = vpop.eup %2472 }
0x1963   :  { %v1313_v19 = vadd.f32 1.0, %v2473_v18 }
0x1965   :  { %2474 = vrcp.f32 %v1313_v19 }
0x1972   :  { %v2475_v20 = vpop.eup %2474 }
0x1973   :  { %v1317_v23 = vmul.f32 %v2475_v20, %v1226_v3  ;;  %v1536_v3 = vld [vmem:[#allocation3 + $0x8] sm:$0x3] }
0x19d3   :  { %v1320_v21 = vpop.permute.xlu0 %1319 }
0x19d4   :  { %v1322_v22 = vmul.f32 %v2475_v20, %v1320_v21 }
0x19d6   :  { %1324 = vrot.lane.b32.xlu1 %v1322_v22, %s2643_s5 }
0x1a48   :  { %v1325_v24 = vpop.permute.xlu1 %1324 }
0x1a49   :  { %v1327_v25 = vadd.f32 %v1325_v24, %v1317_v23 }
0x1a4b   :  { %2476 = vtanh.f32 %v1327_v25 }
0x1a58   :  { %v2477_v26 = vpop.eup %2476 }
0x1a59   :  { %1330 = vrot.lane.b32.xlu0 %v2477_v26, %s2642_s27 }
0x1acb   :  { %v1331_v27 = vpop.permute.xlu0 %1330 }
0x1acc   :  { %v1333_v28 = vmul.f32 %v2475_v20, %v1331_v27 }
0x1ace   :  { %1336 = vrot.lane.b32.xlu1 %v1333_v28, %s2643_s5 }
0x1b40   :  { %v1337_v29 = vpop.permute.xlu1 %1336 }
0x1b41   :  { %2319 = vmatmul.mubr.msk.f32.vlgmr.msra.gmra.mxu0 %vm196_vm2, %v1337_v29 }
0x1b42   :  { %2333 = vmatpush3.msra.mxu0 %v2891_v41  ;;  %2340 = vmatprep.mubr.msk.f32.mxu0 %vm2641_vm0, %v2640_v0 }
0x1b43   :  { %2334 = vmatprep.subr.mxu0 %v2640_v0 }
0x1b44   :  { %2335 = vmatpush3.msra.mxu0 %v2893_v42 }
0x1b45   :  { %2336 = vmatprep.subr.mxu0 %v2640_v0 }
0x1b46   :  { %2337 = vmatpush3.msra.mxu0 %v2898_v44 }
0x1b47   :  { %2338 = vmatprep.subr.mxu0 %v2640_v0 }
0x1b48   :  { %2339 = vmatpush3.msra.mxu0 %v2902_v46 }
0x1b49   :  { %2354 = vmatprep.subr.mxu0 %v2640_v0 }
0x1c01   :  { %v1406_v31 = vpop.f32.mrf.mxu0 }
0x1c02   :  { %v1410_v32 = vadd.f32 %v1406_v31, %v1334_v30 }
0x1c03   :  { %v2320_v33 = vpop.f32.mrf.mxu0 }
0x1c04   :  { %2478 = vtanh.f32 %v1410_v32  ;;  %v2074_v35 = vmul.f32 -1.442695, %v1410_v32 }
0x1c06   :  { %2480 = vpow2.f32 %v2074_v35 }
0x1c11   :  { %v2479_v34 = vpop.eup %2478 }
0x1c12   :  { %1420 = vrot.lane.b32.xlu0 %v2479_v34, %s2642_s27 }
0x1c13   :  { %v2481_v36 = vpop.eup %2480 }
0x1c14   :  { %v1414_v37 = vadd.f32 1.0, %v2481_v36 }
0x1c16   :  { %2482 = vrcp.f32 %v1414_v37 }
0x1c23   :  { %v2483_v38 = vpop.eup %2482 }
0x1c24   :  { %v1418_v43 = vmul.f32 %v2483_v38, %v1327_v25  ;;  %v1637_v25 = vld [vmem:[#allocation3 + $0xa] sm:$0x3] }
0x1c84   :  { %v1421_v39 = vpop.permute.xlu0 %1420 }
0x1c85   :  { %v1423_v40 = vmul.f32 %v2483_v38, %v1421_v39  ;;  %v1738_v39 = vld [vmem:[#allocation3 + $0xc] sm:$0x3] }
0x1c87   :  { %1425 = vrot.lane.b32.xlu1 %v1423_v40, %s2643_s5 }
0x1cf9   :  { %v1426_v45 = vpop.permute.xlu1 %1425 }
0x1cfa   :  { %v1428_v47 = vadd.f32 %v1426_v45, %v1418_v43 }
0x1cfc   :  { %2484 = vtanh.f32 %v1428_v47 }
0x1d09   :  { %v2485_v48 = vpop.eup %2484 }
0x1d0a   :  { %1431 = vrot.lane.b32.xlu0 %v2485_v48, %s2642_s27 }
0x1d7c   :  { %v1432_v49 = vpop.permute.xlu0 %1431 }
0x1d7d   :  { %v1434_v4 = vmul.f32 %v2483_v38, %v1432_v49 }
0x1d7f   :  { %1437 = vrot.lane.b32.xlu1 %v1434_v4, %s2643_s5 }
0x1df1   :  { %v1438_v50 = vpop.permute.xlu1 %1437 }
0x1df2   :  { %2330 = vmatmul.mubr.msk.f32.vlgmr.msra.gmra.mxu1 %vm196_vm2, %v1438_v50 }
0x1df3   :  { %2344 = vmatpush3.msra.mxu1 %v2891_v41  ;;  %2351 = vmatprep.mubr.msk.f32.mxu1 %vm2641_vm0, %v2640_v0 }
0x1df4   :  { %2345 = vmatprep.subr.mxu1 %v2640_v0 }
0x1df5   :  { %2346 = vmatpush3.msra.mxu1 %v2893_v42 }
0x1df6   :  { %2347 = vmatprep.subr.mxu1 %v2640_v0 }
0x1df7   :  { %2348 = vmatpush3.msra.mxu1 %v2898_v44 }
0x1df8   :  { %2349 = vmatprep.subr.mxu1 %v2640_v0 }
0x1df9   :  { %2350 = vmatpush3.msra.mxu1 %v2902_v46 }
0x1dfa   :  { %2365 = vmatprep.subr.mxu1 %v2640_v0 }
0x1eb2   :  { %v1507_v52 = vpop.f32.mrf.mxu1 }
0x1eb3   :  { %v1511_v5 = vadd.f32 %v1507_v52, %v1435_v51 }
0x1eb4   :  { %v2331_v53 = vpop.f32.mrf.mxu1 }
0x1eb5   :  { %2486 = vtanh.f32 %v1511_v5  ;;  %v2076_v54 = vmul.f32 -1.442695, %v1511_v5 }
0x1eb7   :  { %2488 = vpow2.f32 %v2076_v54 }
0x1ec2   :  { %v2487_v7 = vpop.eup %2486 }
0x1ec3   :  { %1521 = vrot.lane.b32.xlu0 %v2487_v7, %s2642_s27 }
0x1ec4   :  { %v2489_v55 = vpop.eup %2488 }
0x1ec5   :  { %v1515_v8 = vadd.f32 1.0, %v2489_v55 }
0x1ec7   :  { %2490 = vrcp.f32 %v1515_v8 }
0x1ed4   :  { %v2491_v56 = vpop.eup %2490 }
0x1ed5   :  { %v1519_v59 = vmul.f32 %v2491_v56, %v1428_v47 }
0x1f35   :  { %v1522_v57 = vpop.permute.xlu0 %1521 }
0x1f36   :  { %v1524_v58 = vmul.f32 %v2491_v56, %v1522_v57  ;;  %v1839_v57 = vld [vmem:[#allocation3 + $0xe] sm:$0x3] }
0x1f38   :  { %1526 = vrot.lane.b32.xlu1 %v1524_v58, %s2643_s5 }
0x1faa   :  { %v1527_v60 = vpop.permute.xlu1 %1526 }
0x1fab   :  { %v1529_v61 = vadd.f32 %v1527_v60, %v1519_v59 }
0x1fad   :  { %2492 = vtanh.f32 %v1529_v61 }
0x1fba   :  { %v2493_v62 = vpop.eup %2492 }
0x1fbb   :  { %1532 = vrot.lane.b32.xlu0 %v2493_v62, %s2642_s27 }
0x202d   :  { %v1533_v63 = vpop.permute.xlu0 %1532 }
0x202e   :  { %v1535_v1 = vmul.f32 %v2491_v56, %v1533_v63 }
0x2030   :  { %1538 = vrot.lane.b32.xlu1 %v1535_v1, %s2643_s5 }
0x20a2   :  { %v1539_v2 = vpop.permute.xlu1 %1538 }
0x20a3   :  { %2341 = vmatmul.mubr.msk.f32.vlgmr.msra.gmra.mxu0 %vm196_vm2, %v1539_v2 }
0x20a4   :  { %2355 = vmatpush3.msra.mxu0 %v2891_v41  ;;  %2362 = vmatprep.mubr.msk.f32.mxu0 %vm2641_vm0, %v2640_v0 }
0x20a5   :  { %2356 = vmatprep.subr.mxu0 %v2640_v0 }
0x20a6   :  { %2357 = vmatpush3.msra.mxu0 %v2893_v42 }
0x20a7   :  { %2358 = vmatprep.subr.mxu0 %v2640_v0 }
0x20a8   :  { %2359 = vmatpush3.msra.mxu0 %v2898_v44 }
0x20a9   :  { %2360 = vmatprep.subr.mxu0 %v2640_v0 }
0x20aa   :  { %2361 = vmatpush3.msra.mxu0 %v2902_v46 }
0x20ab   :  { %2376 = vmatprep.subr.mxu0 %v2640_v0 }
0x2163   :  { %v1608_v6 = vpop.f32.mrf.mxu0 }
0x2164   :  { %v1612_v9 = vadd.f32 %v1608_v6, %v1536_v3 }
0x2165   :  { %v2342_v10 = vpop.f32.mrf.mxu0 }
0x2166   :  { %2494 = vtanh.f32 %v1612_v9  ;;  %v2078_v12 = vmul.f32 -1.442695, %v1612_v9 }
0x2168   :  { %2496 = vpow2.f32 %v2078_v12  ;;  %v1943_v12 = vld [vmem:[%s3063_s9 + $0x18] sm:$0xff] }
0x2173   :  { %v2495_v11 = vpop.eup %2494 }
0x2174   :  { %1622 = vrot.lane.b32.xlu0 %v2495_v11, %s2642_s27 }
0x2175   :  { %v2497_v13 = vpop.eup %2496 }
0x2176   :  { %v1616_v14 = vadd.f32 1.0, %v2497_v13  ;;  %v1942_v13 = vld [vmem:[%s3063_s9 + $0x10] sm:$0xff] }
0x2178   :  { %2498 = vrcp.f32 %v1616_v14  ;;  %v1941_v14 = vld [vmem:[%s3063_s9 + $0x8] sm:$0xff] }
0x2185   :  { %v2499_v15 = vpop.eup %2498 }
0x2186   :  { %v1620_v18 = vmul.f32 %v2499_v15, %v1529_v61 }
0x21e6   :  { %v1623_v16 = vpop.permute.xlu0 %1622 }
0x21e7   :  { %v1625_v17 = vmul.f32 %v2499_v15, %v1623_v16 }
0x21e9   :  { %1627 = vrot.lane.b32.xlu1 %v1625_v17, %s2643_s5 }
0x225b   :  { %v1628_v19 = vpop.permute.xlu1 %1627 }
0x225c   :  { %v1630_v20 = vadd.f32 %v1628_v19, %v1620_v18 }
0x225e   :  { %2500 = vtanh.f32 %v1630_v20 }
0x226b   :  { %v2501_v21 = vpop.eup %2500 }
0x226c   :  { %1633 = vrot.lane.b32.xlu0 %v2501_v21, %s2642_s27 }
0x22de   :  { %v1634_v22 = vpop.permute.xlu0 %1633 }
0x22df   :  { %v1636_v23 = vmul.f32 %v2499_v15, %v1634_v22  ;;  %v1940_v15 = vld [vmem:[%s3063_s9] sm:$0xff]  ;;  %s2034_s9 = sshll.u32 %s2644_s20, 4  ;;  %s2035_s9 = int_to_ptr.vmem [resolvable:$true] %s2034_s9 }
0x22e0   :  { %s2606_s21 = scalar_lea.vmem %s2035_s9, 32  ;;  %p2611_p7 = scmp.lt.s32.totalorder %s2035_s9, %s2035_s9 }
0x22e1   :  { %1639 = vrot.lane.b32.xlu1 %v1636_v23, %s2643_s5  ;;  %p2607_p6 = scmp.ne.s32.totalorder %s2035_s9, %s2606_s21  ;;  %p2612_p8 = scmp.lt.s32.totalorder %s2606_s21, %s2606_s21 }
0x22e3   :  { %p2613_p9 = por %p2612_p8, %p2611_p7 }
0x22e5   :  { %p2614_p10 = pnand %p2613_p9, %p2607_p6 }
0x2353   :  { %v1640_v24 = vpop.permute.xlu1 %1639 }
0x2354   :  { %2352 = vmatmul.mubr.msk.f32.vlgmr.msra.gmra.mxu1 %vm196_vm2, %v1640_v24 }
0x2355   :  { %2366 = vmatpush3.msra.mxu1 %v2891_v41  ;;  %2373 = vmatprep.mubr.msk.f32.mxu1 %vm2641_vm0, %v2640_v0 }
0x2356   :  { %2367 = vmatprep.subr.mxu1 %v2640_v0 }
0x2357   :  { %2368 = vmatpush3.msra.mxu1 %v2893_v42 }
0x2358   :  { %2369 = vmatprep.subr.mxu1 %v2640_v0 }
0x2359   :  { %2370 = vmatpush3.msra.mxu1 %v2898_v44 }
0x235a   :  { %2371 = vmatprep.subr.mxu1 %v2640_v0 }
0x235b   :  { %2372 = vmatpush3.msra.mxu1 %v2902_v46 }
0x2414   :  { %v1709_v26 = vpop.f32.mrf.mxu1 }
0x2415   :  { %v1713_v27 = vadd.f32 %v1709_v26, %v1637_v25 }
0x2416   :  { %v2353_v28 = vpop.f32.mrf.mxu1 }
0x2417   :  { %2502 = vtanh.f32 %v1713_v27  ;;  %v2080_v29 = vmul.f32 -1.442695, %v1713_v27 }
0x2419   :  { %2504 = vpow2.f32 %v2080_v29 }
0x2424   :  { %v2503_v41 = vpop.eup %2502 }
0x2425   :  { %1723 = vrot.lane.b32.xlu0 %v2503_v41, %s2642_s27 }
0x2426   :  { %v2505_v30 = vpop.eup %2504 }
0x2427   :  { %v1717_v42 = vadd.f32 1.0, %v2505_v30 }
0x2429   :  { %2506 = vrcp.f32 %v1717_v42 }
0x2436   :  { %v2507_v31 = vpop.eup %2506 }
0x2437   :  { %v1721_v33 = vmul.f32 %v2507_v31, %v1630_v20  ;;  %v2085_v20 = vld [vmem:[%s3064_s10] ss:$0 sm:$0xff] }
0x2497   :  { %v1724_v32 = vpop.permute.xlu0 %1723 }
0x2498   :  { %v1726_v44 = vmul.f32 %v2507_v31, %v1724_v32 }
0x249a   :  { %1728 = vrot.lane.b32.xlu1 %v1726_v44, %s2643_s5 }
0x250c   :  { %v1729_v46 = vpop.permute.xlu1 %1728 }
0x250d   :  { %v1731_v34 = vadd.f32 %v1729_v46, %v1721_v33 }
0x250f   :  { %2508 = vtanh.f32 %v1731_v34 }
0x251c   :  { %v2509_v35 = vpop.eup %2508 }
0x251d   :  { %1734 = vrot.lane.b32.xlu0 %v2509_v35, %s2642_s27 }
0x258f   :  { %v1735_v36 = vpop.permute.xlu0 %1734 }
0x2590   :  { %v1737_v37 = vmul.f32 %v2507_v31, %v1735_v36 }
0x2592   :  { %1740 = vrot.lane.b32.xlu1 %v1737_v37, %s2643_s5 }
0x2604   :  { %v1741_v38 = vpop.permute.xlu1 %1740 }
0x2605   :  { %2363 = vmatmul.mubr.msk.f32.vlgmr.msra.gmra.mxu0 %vm196_vm2, %v1741_v38 }
0x2606   :  { %2384 = vmatprep.mubr.msk.f32.mxu0 %vm2641_vm0, %v2640_v0  ;;  %2377 = vmatpush3.msra.mxu0 %v1943_v12 }
0x2607   :  { %2378 = vmatprep.subr.mxu0 %v2640_v0 }
0x2608   :  { %2379 = vmatpush3.msra.mxu0 %v1942_v13 }
0x2609   :  { %2380 = vmatprep.subr.mxu0 %v2640_v0 }
0x260a   :  { %2381 = vmatpush3.msra.mxu0 %v1941_v14 }
0x260b   :  { %2382 = vmatprep.subr.mxu0 %v2640_v0 }
0x260c   :  { %2383 = vmatpush3.msra.mxu0 %v1940_v15 }
0x26c5   :  { %v1810_v40 = vpop.f32.mrf.mxu0 }
0x26c6   :  { %v1814_v43 = vadd.f32 %v1810_v40, %v1738_v39 }
0x26c7   :  { %v2364_v45 = vpop.f32.mrf.mxu0 }
0x26c8   :  { %2510 = vtanh.f32 %v1814_v43  ;;  %v2082_v48 = vmul.f32 -1.442695, %v1814_v43 }
0x26ca   :  { %2512 = vpow2.f32 %v2082_v48 }
0x26d5   :  { %v2511_v47 = vpop.eup %2510 }
0x26d6   :  { %1824 = vrot.lane.b32.xlu0 %v2511_v47, %s2642_s27 }
0x26d7   :  { %v2513_v49 = vpop.eup %2512 }
0x26d8   :  { %v1818_v4 = vadd.f32 1.0, %v2513_v49 }
0x26da   :  { %2514 = vrcp.f32 %v1818_v4 }
0x26e7   :  { %v2515_v50 = vpop.eup %2514 }
0x26e8   :  { %v1822_v5 = vmul.f32 %v2515_v50, %v1731_v34 }
0x2748   :  { %v1825_v51 = vpop.permute.xlu0 %1824 }
0x2749   :  { %v1827_v52 = vmul.f32 %v2515_v50, %v1825_v51 }
0x274b   :  { %1829 = vrot.lane.b32.xlu1 %v1827_v52, %s2643_s5 }
0x27bd   :  { %v1830_v53 = vpop.permute.xlu1 %1829 }
0x27be   :  { %v1832_v7 = vadd.f32 %v1830_v53, %v1822_v5 }
0x27c0   :  { %2516 = vtanh.f32 %v1832_v7 }
0x27cd   :  { %v2517_v54 = vpop.eup %2516 }
0x27ce   :  { %1835 = vrot.lane.b32.xlu0 %v2517_v54, %s2642_s27 }
0x2840   :  { %v1836_v55 = vpop.permute.xlu0 %1835 }
0x2841   :  { %v1838_v8 = vmul.f32 %v2515_v50, %v1836_v55 }
0x2843   :  { %1841 = vrot.lane.b32.xlu1 %v1838_v8, %s2643_s5 }
0x28b5   :  { %v1842_v56 = vpop.permute.xlu1 %1841 }
0x28b6   :  { %2374 = vmatmul.mubr.msk.f32.vlgmr.msra.gmra.mxu1 %vm196_vm2, %v1842_v56 }
0x2976   :  { %v1911_v58 = vpop.f32.mrf.mxu1 }
0x2977   :  { %v1915_v59 = vadd.f32 %v1911_v58, %v1839_v57 }
0x2978   :  { %v2375_v60 = vpop.f32.mrf.mxu1 }
0x2979   :  { %2518 = vtanh.f32 %v1915_v59  ;;  %v2084_v62 = vmul.f32 -1.442695, %v1915_v59 }
0x297b   :  { %2520 = vpow2.f32 %v2084_v62 }
0x2986   :  { %v2519_v61 = vpop.eup %2518 }
0x2987   :  { %1925 = vrot.lane.b32.xlu0 %v2519_v61, %s2642_s27 }
0x2988   :  { %v2521_v63 = vpop.eup %2520 }
0x2989   :  { %v1919_v1 = vadd.f32 1.0, %v2521_v63 }
0x298b   :  { %2522 = vrcp.f32 %v1919_v1 }
0x2998   :  { %v2523_v2 = vpop.eup %2522 }
0x2999   :  { %v1923_v9 = vmul.f32 %v2523_v2, %v1832_v7 }
0x29f9   :  { %v1926_v3 = vpop.permute.xlu0 %1925 }
0x29fa   :  { %v1928_v6 = vmul.f32 %v2523_v2, %v1926_v3 }
0x29fc   :  { %1930 = vrot.lane.b32.xlu1 %v1928_v6, %s2643_s5 }
0x2a6e   :  { %v1931_v10 = vpop.permute.xlu1 %1930 }
0x2a6f   :  { %v1933_v11 = vadd.f32 %v1931_v10, %v1923_v9 }
0x2a71   :  { %2524 = vtanh.f32 %v1933_v11 }
0x2a7e   :  { %v2525_v16 = vpop.eup %2524 }
0x2a7f   :  { %1936 = vrot.lane.b32.xlu0 %v2525_v16, %s2642_s27 }
0x2af1   :  { %v1937_v17 = vpop.permute.xlu0 %1936 }
0x2af2   :  { %v1939_v18 = vmul.f32 %v2523_v2, %v1937_v17 }
0x2af4   :  { %1952 = vrot.lane.b32.xlu1 %v1939_v18, %s2643_s5 }
0x2b66   :  { %v1953_v19 = vpop.permute.xlu1 %1952 }
0x2b67   :  { %2385 = vmatmul.mubr.msk.f32.vlgmr.msra.gmra.mxu0 %vm196_vm2, %v1953_v19 }
0x2c27   :  { %v2022_v21 = vpop.f32.mrf.mxu0 }
0x2c28   :  { %v2023_v0 = vadd.f32 %v2085_v20, %v2022_v21 }
0x2c29   :  { %v2386_v22 = vpop.f32.mrf.mxu0 }
0x2c2a   :  { %2027 = vst.msk [vmem:[#allocation12] sm:$0x3] %vm2026_vm4, %v2023_v0 }
0x2c2b   :  { %2617 = shalt.err (!%p2614_p10)
}
0x2c2c   :  { %2037 = dma.vmem_to_hbm [thread:$0]  %s2035_s9, 32, %s3065_s11, [#allocation6]  }
0x2c2d   :  { %2632 = dma.done.wait [#allocation6], 32  }
0x2c2e   :  { %2633 = vsyncadd [#allocation6], 4294967264 }
0x2c2f   :  { %2041 = vsyncpa [#allocation5], 1 }
0x2c30   :  { %2042 = vsyncpa [#allocation8], 1 }
0x2c31   :  { %2043 = vsyncpa [#allocation11], 1 }
0x2c32   :  { %2044 = vsyncpa [#allocation6], 1 }

</bundles_post_ra>
